<compile_context>
chip_gen: v6e
topology: v6e:2x2x1
jax: 0.10.0
libtpu: 0.0.40
codegen_flags: <defaults>
</compile_context>

<pallas_src>
import functools
import math

import jax
import jax.numpy as jnp
from jax import lax
from jax.experimental import pallas as pl
from jax.experimental.pallas import tpu as pltpu

_LANES = 1024         # wide lane-dense last dim (multiple of 128): dense vst, big DMAs
_MAX_TILE_ROWS = 512  # 512 x 1024 f32 = 2 MiB / tile -> ~8 MiB pipelined + temporaries


def _mix32(x):
    """murmur3 fmix32 finalizer on uint32 (full avalanche); plain VPU int ops."""
    x = x ^ (x >> 16)
    x = x * jnp.uint32(0x7FEB352D)
    x = x ^ (x >> 15)
    x = x * jnp.uint32(0x846CA68B)
    x = x ^ (x >> 16)
    return x


def _gaussian_noise_kernel(seed_ref, sigma_ref, mean_ref, img_ref, out_ref):
    # Scalar (SMEM) reads first, before any vector work / pipeline boundaries.
    sigma = sigma_ref[0]
    mean = mean_ref[0]
    seed = seed_ref[0].astype(jnp.uint32)

    tile_r, lanes = img_ref.shape
    half_r = tile_r // 2

    # Unique per-element counters across grid tiles.  Each counter produces a
    # full Box-Muller PAIR, so only half a tile of counters is needed.
    pid = pl.program_id(0).astype(jnp.uint32)
    base = pid * jnp.uint32(half_r * lanes)
    row = lax.broadcasted_iota(jnp.uint32, (half_r, lanes), 0)
    col = lax.broadcasted_iota(jnp.uint32, (half_r, lanes), 1)
    ctr = base + row * jnp.uint32(lanes) + col

    # Two independent 32-bit streams from the counter-based hash.
    b1 = _mix32(ctr ^ seed)
    b2 = _mix32(b1 + jnp.uint32(0x9E3779B9))

    # Uniforms via 24-bit mantissa trick: u1 in (0, 1] (log stays finite),
    # u2 in [0, 1).
    inv24 = jnp.float32(1.0 / (1 << 24))
    u1 = ((b1 >> 8) + 1).astype(jnp.int32).astype(jnp.float32) * inv24
    u2 = (b2 >> 8).astype(jnp.int32).astype(jnp.float32) * inv24

    # Full Box-Muller pair: one log/sqrt/cos/sin per TWO output elements (EUP).
    r = jnp.sqrt(jnp.float32(-2.0) * jnp.log(u1))
    theta = jnp.float32(2.0 * math.pi) * u2
    z1 = r * jnp.cos(theta)
    z2 = r * jnp.sin(theta)

    img = img_ref[...]
    out_ref[0:half_r, :] = img[0:half_r, :] + (z1 * sigma + mean)
    out_ref[half_r:tile_r, :] = img[half_r:tile_r, :] + (z2 * sigma + mean)


@functools.partial(jax.jit, static_argnames=("mean", "sigma_min", "sigma_max"))
def gaussian_noise(image, key, *, mean, sigma_min, sigma_max):
    """Pallas TPU implementation of GaussianNoise.forward.

    image: float array with [..., C, H, W] layout (op is elementwise; layout
           only matters for the flatten/unflatten plumbing).
    key:   jax PRNG key; used to draw sigma ~ U(sigma_min, sigma_max) and to
           seed the in-kernel noise generator.
    """
    orig_shape = image.shape
    orig_dtype = image.dtype
    total = int(image.size)

    rows = pl.cdiv(total, _LANES)

    # Zero-copy fast path: the flattened image is already a whole number of
    # 16-row-aligned (rows, 1024) lines and fits one tile -> single full-array
    # block, no pad, no extra HBM copy.  Otherwise pad to a multiple of the
    # (16-aligned) row tile so there is no ragged tile; each half-tile stays
    # sublane aligned for the two Box-Muller output stores.
    if (total % _LANES == 0) and (rows % 16 == 0) and (rows <= _MAX_TILE_ROWS):
        tile_r = rows
    else:
        tile_r = min(_MAX_TILE_ROWS, pl.cdiv(rows, 16) * 16)
    rows_padded = pl.cdiv(rows, tile_r) * tile_r
    padded_total = rows_padded * _LANES

    x = image.reshape(-1)
    if x.dtype != jnp.float32:
        x = x.astype(jnp.float32)
    if padded_total != total:
        x = jnp.pad(x, (0, padded_total - total))
    x2d = x.reshape(rows_padded, _LANES)

    # sigma drawn once per call, mirroring torch.empty(1).uniform_().
    k_sigma, k_seed = jax.random.split(key)
    sigma = jax.random.uniform(
        k_sigma, (1,), jnp.float32, minval=sigma_min, maxval=sigma_max)
    seed = jax.random.randint(k_seed, (1,), 0, 2**31 - 1, dtype=jnp.int32)
    mean_arr = jnp.full((1,), mean, dtype=jnp.float32)

    grid = (rows_padded // tile_r,)
    out2d = pl.pallas_call(
        _gaussian_noise_kernel,
        out_shape=jax.ShapeDtypeStruct((rows_padded, _LANES), jnp.float32),
        grid=grid,
        in_specs=[
            pl.BlockSpec(memory_space=pltpu.MemorySpace.SMEM),   # seed
            pl.BlockSpec(memory_space=pltpu.MemorySpace.SMEM),   # sigma
            pl.BlockSpec(memory_space=pltpu.MemorySpace.SMEM),   # mean
            pl.BlockSpec((tile_r, _LANES), lambda i: (i, 0)),    # image tile
        ],
        out_specs=pl.BlockSpec((tile_r, _LANES), lambda i: (i, 0)),
        compiler_params=pltpu.CompilerParams(
            dimension_semantics=("parallel",),
            vmem_limit_bytes=32 * 1024 * 1024,
        ),
    )(seed, sigma, mean_arr, x2d)

    out = out2d.reshape(-1)
    if padded_total != total:
        out = out[:total]
    return out.reshape(orig_shape).astype(orig_dtype)


if __name__ == "__main__":
    # Module "parameters" (from __init__ signature / defaults).
    MEAN = 0.0
    SIGMA = (0.1, 0.5)

    key = jax.random.PRNGKey(0)
    k_img, k_noise = jax.random.split(key)

    # Small NCHW image, consistent with [..., C, H, W] expectation.
    x = jax.random.normal(k_img, (2, 4, 16, 16), dtype=jnp.float32)

    out = gaussian_noise(
        x, k_noise, mean=MEAN, sigma_min=SIGMA[0], sigma_max=SIGMA[1])
    out = jax.block_until_ready(out)

    # Sanity: shape/dtype preserved, finite, noise actually injected with a
    # std roughly inside the sigma range, and ~zero-mean.
    assert out.shape == x.shape and out.dtype == x.dtype
    diff = out - x
    assert bool(jnp.all(jnp.isfinite(out)))
    std = float(jnp.std(diff))
    assert 0.05 < std < 0.7
    assert abs(float(jnp.mean(diff))) < 0.1

    print("KERNEL_OK")
</pallas_src>

<mosaic_0001>
module attributes {stable_mosaic.version = 11 : i64} {
  func.func @_gaussian_noise_kernel(%arg0: i32, %arg1: memref<1xi32, #tpu.memory_space<smem>>, %arg2: memref<1xf32, #tpu.memory_space<smem>>, %arg3: memref<1xf32, #tpu.memory_space<smem>>, %arg4: memref<16x1024xf32, #tpu.memory_space<vmem>>, %arg5: memref<16x1024xf32, #tpu.memory_space<vmem>>) attributes {dimension_semantics = [#tpu.dimension_semantics<parallel>], iteration_bounds = array<i64: 1>, scalar_prefetch = 0 : i64, scratch_operands = 0 : i64, tpu.core_type = #tpu.core_type<tc>, window_params = [{transform_indices = @transform_0, window_bounds = array<i64: 1>}, {transform_indices = @transform_1, window_bounds = array<i64: 1>}, {transform_indices = @transform_2, window_bounds = array<i64: 1>}, {transform_indices = @transform_3, window_bounds = array<i64: 16, 1024>}, {transform_indices = @transform_4, window_bounds = array<i64: 16, 1024>}]} {
    %c0 = arith.constant 0 : index
    %0 = memref.load %arg2[%c0] : memref<1xf32, #tpu.memory_space<smem>>
    %c0_0 = arith.constant 0 : index
    %1 = memref.load %arg3[%c0_0] : memref<1xf32, #tpu.memory_space<smem>>
    %c0_1 = arith.constant 0 : index
    %2 = memref.load %arg1[%c0_1] : memref<1xi32, #tpu.memory_space<smem>>
    %c8192_i32 = arith.constant 8192 : i32
    %3 = arith.muli %arg0, %c8192_i32 : i32
    %4 = tpu.iota {dimensions = array<i32: 0>} : vector<8x1024xi32>
    %5 = tpu.iota {dimensions = array<i32: 1>} : vector<8x1024xi32>
    %c1024_i32 = arith.constant 1024 : i32
    %6 = vector.broadcast %c1024_i32 : i32 to vector<8x1024xi32>
    %7 = arith.muli %4, %6 : vector<8x1024xi32>
    %8 = vector.broadcast %3 : i32 to vector<8x1024xi32>
    %9 = arith.addi %8, %7 : vector<8x1024xi32>
    %10 = arith.addi %9, %5 : vector<8x1024xi32>
    %11 = vector.broadcast %2 : i32 to vector<8x1024xi32>
    %12 = arith.xori %10, %11 : vector<8x1024xi32>
    %c16_i32 = arith.constant 16 : i32
    %13 = vector.broadcast %c16_i32 : i32 to vector<8x1024xi32>
    %14 = arith.shrui %12, %13 : vector<8x1024xi32>
    %15 = arith.xori %12, %14 : vector<8x1024xi32>
    %c2146121005_i32 = arith.constant 2146121005 : i32
    %16 = vector.broadcast %c2146121005_i32 : i32 to vector<8x1024xi32>
    %17 = arith.muli %15, %16 : vector<8x1024xi32>
    %c15_i32 = arith.constant 15 : i32
    %18 = vector.broadcast %c15_i32 : i32 to vector<8x1024xi32>
    %19 = arith.shrui %17, %18 : vector<8x1024xi32>
    %20 = arith.xori %17, %19 : vector<8x1024xi32>
    %c-2073254261_i32 = arith.constant -2073254261 : i32
    %21 = vector.broadcast %c-2073254261_i32 : i32 to vector<8x1024xi32>
    %22 = arith.muli %20, %21 : vector<8x1024xi32>
    %c16_i32_2 = arith.constant 16 : i32
    %23 = vector.broadcast %c16_i32_2 : i32 to vector<8x1024xi32>
    %24 = arith.shrui %22, %23 : vector<8x1024xi32>
    %25 = arith.xori %22, %24 : vector<8x1024xi32>
    %c-1640531527_i32 = arith.constant -1640531527 : i32
    %26 = vector.broadcast %c-1640531527_i32 : i32 to vector<8x1024xi32>
    %27 = arith.addi %25, %26 : vector<8x1024xi32>
    %c16_i32_3 = arith.constant 16 : i32
    %28 = vector.broadcast %c16_i32_3 : i32 to vector<8x1024xi32>
    %29 = arith.shrui %27, %28 : vector<8x1024xi32>
    %30 = arith.xori %27, %29 : vector<8x1024xi32>
    %c2146121005_i32_4 = arith.constant 2146121005 : i32
    %31 = vector.broadcast %c2146121005_i32_4 : i32 to vector<8x1024xi32>
    %32 = arith.muli %30, %31 : vector<8x1024xi32>
    %c15_i32_5 = arith.constant 15 : i32
    %33 = vector.broadcast %c15_i32_5 : i32 to vector<8x1024xi32>
    %34 = arith.shrui %32, %33 : vector<8x1024xi32>
    %35 = arith.xori %32, %34 : vector<8x1024xi32>
    %c-2073254261_i32_6 = arith.constant -2073254261 : i32
    %36 = vector.broadcast %c-2073254261_i32_6 : i32 to vector<8x1024xi32>
    %37 = arith.muli %35, %36 : vector<8x1024xi32>
    %c16_i32_7 = arith.constant 16 : i32
    %38 = vector.broadcast %c16_i32_7 : i32 to vector<8x1024xi32>
    %39 = arith.shrui %37, %38 : vector<8x1024xi32>
    %40 = arith.xori %37, %39 : vector<8x1024xi32>
    %c8_i32 = arith.constant 8 : i32
    %41 = vector.broadcast %c8_i32 : i32 to vector<8x1024xi32>
    %42 = arith.shrui %25, %41 : vector<8x1024xi32>
    %c1_i32 = arith.constant 1 : i32
    %43 = vector.broadcast %c1_i32 : i32 to vector<8x1024xi32>
    %44 = arith.addi %42, %43 : vector<8x1024xi32>
    %45 = arith.sitofp %44 : vector<8x1024xi32> to vector<8x1024xf32>
    %cst = arith.constant 5.96046448E-8 : f32
    %46 = vector.broadcast %cst : f32 to vector<8x1024xf32>
    %47 = arith.mulf %45, %46 : vector<8x1024xf32>
    %c8_i32_8 = arith.constant 8 : i32
    %48 = vector.broadcast %c8_i32_8 : i32 to vector<8x1024xi32>
    %49 = arith.shrui %40, %48 : vector<8x1024xi32>
    %50 = arith.sitofp %49 : vector<8x1024xi32> to vector<8x1024xf32>
    %cst_9 = arith.constant 5.96046448E-8 : f32
    %51 = vector.broadcast %cst_9 : f32 to vector<8x1024xf32>
    %52 = arith.mulf %50, %51 : vector<8x1024xf32>
    %53 = math.log %47 : vector<8x1024xf32>
    %cst_10 = arith.constant -2.000000e+00 : f32
    %54 = vector.broadcast %cst_10 : f32 to vector<8x1024xf32>
    %55 = arith.mulf %54, %53 : vector<8x1024xf32>
    %56 = math.sqrt %55 : vector<8x1024xf32>
    %cst_11 = arith.constant 6.28318548 : f32
    %57 = vector.broadcast %cst_11 : f32 to vector<8x1024xf32>
    %58 = arith.mulf %57, %52 : vector<8x1024xf32>
    %59 = math.cos %58 : vector<8x1024xf32>
    %60 = arith.mulf %56, %59 : vector<8x1024xf32>
    %61 = math.sin %58 : vector<8x1024xf32>
    %62 = arith.mulf %56, %61 : vector<8x1024xf32>
    %c0_12 = arith.constant 0 : index
    %c0_13 = arith.constant 0 : index
    %63 = vector.load %arg4[%c0_12, %c0_13] : memref<16x1024xf32, #tpu.memory_space<vmem>>, vector<16x1024xf32>
    %64 = vector.extract_strided_slice %63 {offsets = [0, 0], sizes = [8, 1024], strides = [1, 1]} : vector<16x1024xf32> to vector<8x1024xf32>
    %65 = vector.broadcast %0 : f32 to vector<8x1024xf32>
    %66 = arith.mulf %60, %65 : vector<8x1024xf32>
    %67 = vector.broadcast %1 : f32 to vector<8x1024xf32>
    %68 = arith.addf %66, %67 : vector<8x1024xf32>
    %69 = arith.addf %64, %68 : vector<8x1024xf32>
    %c0_14 = arith.constant 0 : index
    %c0_15 = arith.constant 0 : index
    %70 = vector.load %arg5[%c0_14, %c0_15] : memref<16x1024xf32, #tpu.memory_space<vmem>>, vector<8x1024xf32>
    tpu.vector_store %arg5[%c0_14, %c0_15], %69 {strides = array<i32>} : memref<16x1024xf32, #tpu.memory_space<vmem>>, vector<8x1024xf32>,
    %71 = vector.extract_strided_slice %63 {offsets = [8, 0], sizes = [8, 1024], strides = [1, 1]} : vector<16x1024xf32> to vector<8x1024xf32>
    %72 = vector.broadcast %0 : f32 to vector<8x1024xf32>
    %73 = arith.mulf %62, %72 : vector<8x1024xf32>
    %74 = vector.broadcast %1 : f32 to vector<8x1024xf32>
    %75 = arith.addf %73, %74 : vector<8x1024xf32>
    %76 = arith.addf %71, %75 : vector<8x1024xf32>
    %c8 = arith.constant 8 : index
    %c0_16 = arith.constant 0 : index
    %77 = vector.load %arg5[%c8, %c0_16] : memref<16x1024xf32, #tpu.memory_space<vmem>>, vector<8x1024xf32>
    tpu.vector_store %arg5[%c8, %c0_16], %76 {strides = array<i32>} : memref<16x1024xf32, #tpu.memory_space<vmem>>, vector<8x1024xf32>,
    return
  }
  func.func @transform_0(%arg0: i32) -> i32 {
    %c0_i32 = arith.constant 0 : i32
    %c0_i32_0 = arith.constant 0 : i32
    return %c0_i32 : i32
  }
  func.func @transform_1(%arg0: i32) -> i32 {
    %c0_i32 = arith.constant 0 : i32
    %c0_i32_0 = arith.constant 0 : i32
    return %c0_i32 : i32
  }
  func.func @transform_2(%arg0: i32) -> i32 {
    %c0_i32 = arith.constant 0 : i32
    %c0_i32_0 = arith.constant 0 : i32
    return %c0_i32 : i32
  }
  func.func @transform_3(%arg0: i32) -> (i32, i32) {
    %c0_i32 = arith.constant 0 : i32
    %c0_i32_0 = arith.constant 0 : i32
    return %arg0, %c0_i32 : i32, i32
  }
  func.func @transform_4(%arg0: i32) -> (i32, i32) {
    %c0_i32 = arith.constant 0 : i32
    %c0_i32_0 = arith.constant 0 : i32
    return %arg0, %c0_i32 : i32, i32
  }
}

</mosaic_0001>

<bundles_post_ra>
// kernel: gaussian_noise.1
= control target key start
LH: loop header
LB: loop body
LE: loop exit
PB: predicated region body
PF: predicated region fallthrough
CT: control target
= control target key end

     0   :  { %v24_v0 = vlaneseq  ;;  %s3549_s0 = inlined_call_operand.<no memory space> [shape: s32[1], index: 0, kind: input, shape index: {}]   ;;  %s3550_s1 = inlined_call_operand.<no memory space> [shape: f32[1], index: 1, kind: input, shape index: {}]   ;;  %s3551_s2 = inlined_call_operand.<no memory space> [shape: f32[1], index: 2, kind: input, shape index: {}]   ;;  %s3552_s3 = inlined_call_operand.vmem [shape: f32[16,1024], index: 3, kind: input, shape index: {}]   ;;  %s3553_s4 = inlined_call_operand.vmem [shape: f32[16,1024], index: 4, kind: output, shape index: {}]  }
   0x1   :  { %v46_v11 = vstv %s3549_s0 }
   0x2   :  { %v25_v1 = vshrl.u32 %v24_v0, 7  ;;  %v27_v2 = vand.u32 127, %v24_v0 }
   0x4   :  { %v28_v3 = vadd.s32 128, %v27_v2  ;;  %v29_v4 = vadd.s32 256, %v27_v2  ;;  %v30_v5 = vadd.s32 384, %v27_v2  ;;  %v31_v6 = vadd.s32 512, %v27_v2 }
   0x5   :  { %v32_v7 = vadd.s32 640, %v27_v2  ;;  %v33_v8 = vadd.s32 768, %v27_v2  ;;  %v34_v9 = vadd.s32 896, %v27_v2  ;;  %v35_v10 = vmul.u32 1024, %v25_v1 }
   0x7   :  { %v38_v12 = vadd.s32 %v35_v10, %v27_v2  ;;  %v39_v13 = vadd.s32 %v35_v10, %v28_v3  ;;  %v40_v14 = vadd.s32 %v35_v10, %v29_v4  ;;  %v41_v15 = vadd.s32 %v35_v10, %v30_v5 }
   0x8   :  { %v42_v16 = vadd.s32 %v35_v10, %v31_v6  ;;  %v43_v17 = vadd.s32 %v35_v10, %v32_v7  ;;  %v44_v18 = vadd.s32 %v35_v10, %v33_v8  ;;  %v45_v19 = vadd.s32 %v35_v10, %v34_v9 }
   0x9   :  { %v47_v20 = vxor.u32 %v46_v11, %v38_v12  ;;  %v48_v21 = vxor.u32 %v46_v11, %v39_v13  ;;  %v49_v22 = vxor.u32 %v46_v11, %v40_v14  ;;  %v50_v23 = vxor.u32 %v46_v11, %v41_v15 }
   0xa   :  { %v51_v24 = vxor.u32 %v46_v11, %v42_v16  ;;  %v52_v25 = vxor.u32 %v46_v11, %v43_v17  ;;  %v53_v26 = vxor.u32 %v46_v11, %v44_v18  ;;  %v54_v27 = vxor.u32 %v46_v11, %v45_v19 }
   0xb   :  { %v55_v28 = vshrl.u32 %v47_v20, 16  ;;  %v56_v29 = vshrl.u32 %v48_v21, 16  ;;  %v57_v30 = vshrl.u32 %v49_v22, 16  ;;  %v58_v31 = vshrl.u32 %v50_v23, 16 }
   0xc   :  { %v59_v32 = vshrl.u32 %v51_v24, 16  ;;  %v60_v33 = vshrl.u32 %v52_v25, 16  ;;  %v61_v34 = vshrl.u32 %v53_v26, 16  ;;  %v62_v35 = vshrl.u32 %v54_v27, 16 }
   0xd   :  { %v63_v36 = vxor.u32 %v55_v28, %v47_v20  ;;  %v64_v37 = vxor.u32 %v56_v29, %v48_v21  ;;  %v65_v38 = vxor.u32 %v57_v30, %v49_v22  ;;  %v66_v39 = vxor.u32 %v58_v31, %v50_v23 }
   0xe   :  { %v67_v40 = vxor.u32 %v59_v32, %v51_v24  ;;  %v68_v41 = vxor.u32 %v60_v33, %v52_v25  ;;  %v69_v42 = vxor.u32 %v61_v34, %v53_v26  ;;  %v70_v43 = vxor.u32 %v62_v35, %v54_v27 }
   0xf   :  { %v71_v44 = vmul.u32 2146121005, %v63_v36  ;;  %v72_v45 = vmul.u32 2146121005, %v64_v37 }
  0x10   :  { %v73_v46 = vmul.u32 2146121005, %v65_v38  ;;  %v74_v47 = vmul.u32 2146121005, %v66_v39 }
  0x11   :  { %v75_v48 = vmul.u32 2146121005, %v67_v40  ;;  %v76_v49 = vmul.u32 2146121005, %v68_v41  ;;  %v79_v50 = vshrl.u32 %v71_v44, 15  ;;  %v80_v51 = vshrl.u32 %v72_v45, 15 }
  0x12   :  { %v77_v52 = vmul.u32 2146121005, %v69_v42  ;;  %v78_v53 = vmul.u32 2146121005, %v70_v43  ;;  %v81_v54 = vshrl.u32 %v73_v46, 15  ;;  %v82_v55 = vshrl.u32 %v74_v47, 15 }
  0x13   :  { %v83_v56 = vshrl.u32 %v75_v48, 15  ;;  %v84_v57 = vshrl.u32 %v76_v49, 15  ;;  %v87_v58 = vxor.u32 %v79_v50, %v71_v44  ;;  %v88_v59 = vxor.u32 %v80_v51, %v72_v45 }
  0x14   :  { %v85_v60 = vshrl.u32 %v77_v52, 15  ;;  %v86_v61 = vshrl.u32 %v78_v53, 15  ;;  %v89_v62 = vxor.u32 %v81_v54, %v73_v46  ;;  %v90_v63 = vxor.u32 %v82_v55, %v74_v47 }
  0x15   :  { %v91_v0 = vxor.u32 %v83_v56, %v75_v48  ;;  %v92_v1 = vxor.u32 %v84_v57, %v76_v49  ;;  %v95_v2 = vmul.u32 2221713035, %v87_v58  ;;  %v96_v3 = vmul.u32 2221713035, %v88_v59 }
  0x16   :  { %v93_v4 = vxor.u32 %v85_v60, %v77_v52  ;;  %v94_v5 = vxor.u32 %v86_v61, %v78_v53  ;;  %v97_v6 = vmul.u32 2221713035, %v89_v62  ;;  %v98_v7 = vmul.u32 2221713035, %v90_v63 }
  0x17   :  { %v99_v8 = vmul.u32 2221713035, %v91_v0  ;;  %v100_v9 = vmul.u32 2221713035, %v92_v1  ;;  %v103_v10 = vshrl.u32 %v95_v2, 16  ;;  %v104_v11 = vshrl.u32 %v96_v3, 16 }
  0x18   :  { %v101_v12 = vmul.u32 2221713035, %v93_v4  ;;  %v102_v13 = vmul.u32 2221713035, %v94_v5  ;;  %v105_v14 = vshrl.u32 %v97_v6, 16  ;;  %v106_v17 = vshrl.u32 %v98_v7, 16 }
  0x19   :  { %v2293_v15 = vxor.u32 %v103_v10, %v95_v2  ;;  %v2295_v16 = vxor.u32 %v104_v11, %v96_v3  ;;  %v107_v18 = vshrl.u32 %v99_v8, 16  ;;  %v108_v19 = vshrl.u32 %v100_v9, 16 }
  0x1a   :  { %v109_v20 = vshrl.u32 %v101_v12, 16  ;;  %v110_v23 = vshrl.u32 %v102_v13, 16  ;;  %v2299_v24 = vxor.u32 %v105_v14, %v97_v6  ;;  %v2301_v27 = vxor.u32 %v106_v17, %v98_v7 }
  0x1b   :  { %v119_v21 = vadd.s32 2654435769, %v2293_v15  ;;  %v120_v22 = vadd.s32 2654435769, %v2295_v16  ;;  %v2303_v28 = vxor.u32 %v107_v18, %v99_v8  ;;  %v2305_v29 = vxor.u32 %v108_v19, %v100_v9 }
  0x1c   :  { %v2307_v30 = vxor.u32 %v109_v20, %v101_v12  ;;  %v2309_v33 = vxor.u32 %v110_v23, %v102_v13  ;;  %v121_v34 = vadd.s32 2654435769, %v2299_v24  ;;  %v122_v36 = vadd.s32 2654435769, %v2301_v27 }
  0x1d   :  { %v127_v25 = vshrl.u32 %v119_v21, 16  ;;  %v128_v26 = vshrl.u32 %v120_v22, 16  ;;  %v123_v37 = vadd.s32 2654435769, %v2303_v28  ;;  %v124_v38 = vadd.s32 2654435769, %v2305_v29 }
  0x1e   :  { %v125_v39 = vadd.s32 2654435769, %v2307_v30  ;;  %v126_v42 = vadd.s32 2654435769, %v2309_v33  ;;  %v129_v43 = vshrl.u32 %v121_v34, 16  ;;  %v130_v44 = vshrl.u32 %v122_v36, 16 }
  0x1f   :  { %v135_v31 = vxor.u32 %v127_v25, %v119_v21  ;;  %v136_v32 = vxor.u32 %v128_v26, %v120_v22  ;;  %v131_v45 = vshrl.u32 %v123_v37, 16  ;;  %v132_v47 = vshrl.u32 %v124_v38, 16 }
  0x20   :  { %v133_v48 = vshrl.u32 %v125_v39, 16  ;;  %v134_v50 = vshrl.u32 %v126_v42, 16  ;;  %v137_v51 = vxor.u32 %v129_v43, %v121_v34  ;;  %v138_v52 = vxor.u32 %v130_v44, %v122_v36 }
  0x21   :  { %v143_v35 = vmul.u32 2146121005, %v135_v31  ;;  %v144_v41 = vmul.u32 2146121005, %v136_v32  ;;  %v139_v53 = vxor.u32 %v131_v45, %v123_v37  ;;  %v140_v55 = vxor.u32 %v132_v47, %v124_v38 }
  0x22   :  { %v141_v56 = vxor.u32 %v133_v48, %v125_v39  ;;  %v142_v58 = vxor.u32 %v134_v50, %v126_v42  ;;  %v145_v59 = vmul.u32 2146121005, %v137_v51  ;;  %v146_v60 = vmul.u32 2146121005, %v138_v52 }
  0x23   :  { %v151_v40 = vshrl.u32 %v143_v35, 15  ;;  %v152_v49 = vshrl.u32 %v144_v41, 15  ;;  %v147_v61 = vmul.u32 2146121005, %v139_v53  ;;  %v148_v63 = vmul.u32 2146121005, %v140_v55 }
  0x24   :  { %v149_v0 = vmul.u32 2146121005, %v141_v56  ;;  %v150_v2 = vmul.u32 2146121005, %v142_v58  ;;  %v153_v3 = vshrl.u32 %v145_v59, 15  ;;  %v154_v4 = vshrl.u32 %v146_v60, 15 }
  0x25   :  { %v159_v46 = vxor.u32 %v151_v40, %v143_v35  ;;  %v160_v57 = vxor.u32 %v152_v49, %v144_v41  ;;  %v155_v5 = vshrl.u32 %v147_v61, 15  ;;  %v156_v7 = vshrl.u32 %v148_v63, 15 }
  0x26   :  { %v157_v8 = vshrl.u32 %v149_v0, 15  ;;  %v158_v10 = vshrl.u32 %v150_v2, 15  ;;  %v161_v11 = vxor.u32 %v153_v3, %v145_v59  ;;  %v162_v12 = vxor.u32 %v154_v4, %v146_v60 }
  0x27   :  { %v167_v54 = vmul.u32 2221713035, %v159_v46  ;;  %v168_v1 = vmul.u32 2221713035, %v160_v57  ;;  %v163_v13 = vxor.u32 %v155_v5, %v147_v61  ;;  %v164_v17 = vxor.u32 %v156_v7, %v148_v63 }
  0x28   :  { %v165_v18 = vxor.u32 %v157_v8, %v149_v0  ;;  %v166_v21 = vxor.u32 %v158_v10, %v150_v2  ;;  %v169_v22 = vmul.u32 2221713035, %v161_v11  ;;  %v170_v23 = vmul.u32 2221713035, %v162_v12 }
  0x29   :  { %v175_v62 = vshrl.u32 %v167_v54, 16  ;;  %v176_v9 = vshrl.u32 %v168_v1, 16  ;;  %v171_v25 = vmul.u32 2221713035, %v163_v13  ;;  %v172_v31 = vmul.u32 2221713035, %v164_v17 }
  0x2a   :  { %v173_v32 = vmul.u32 2221713035, %v165_v18  ;;  %v191_v34 = vshrl.u32 %v2293_v15, 8  ;;  %v174_v37 = vmul.u32 2221713035, %v166_v21  ;;  %v177_v38 = vshrl.u32 %v169_v22, 16 }
  0x2b   :  { %v183_v6 = vxor.u32 %v175_v62, %v167_v54  ;;  %v184_v19 = vxor.u32 %v176_v9, %v168_v1  ;;  %v178_v39 = vshrl.u32 %v170_v23, 16  ;;  %v179_v40 = vshrl.u32 %v171_v25, 16 }
  0x2c   :  { %v192_v41 = vshrl.u32 %v2295_v16, 8  ;;  %v193_v42 = vshrl.u32 %v2299_v24, 8  ;;  %v180_v43 = vshrl.u32 %v172_v31, 16  ;;  %v181_v44 = vshrl.u32 %v173_v32, 16 }
  0x2d   :  { %v223_v14 = vshrl.u32 %v183_v6, 8  ;;  %v224_v35 = vshrl.u32 %v184_v19, 8  ;;  %v194_v45 = vshrl.u32 %v2301_v27, 8  ;;  %v195_v47 = vshrl.u32 %v2303_v28, 8 }
  0x2e   :  { %v196_v15 = vshrl.u32 %v2305_v29, 8  ;;  %v199_v48 = vadd.s32 1, %v191_v34  ;;  %v182_v50 = vshrl.u32 %v174_v37, 16  ;;  %v185_v51 = vxor.u32 %v177_v38, %v169_v22 }
  0x2f   :  { %v231_v20 = vcvt.s32.f32 %v223_v14  ;;  %v232_v49 = vcvt.s32.f32 %v224_v35  ;;  %v197_v52 = vshrl.u32 %v2307_v30, 8  ;;  %v186_v16 = vxor.u32 %v178_v39, %v170_v23 }
  0x30   :  { %v198_v24 = vshrl.u32 %v2309_v33, 8  ;;  %v200_v54 = vadd.s32 1, %v192_v41  ;;  %v201_v55 = vadd.s32 1, %v193_v42  ;;  %v187_v56 = vxor.u32 %v179_v40, %v171_v25 }
  0x31   :  { %v239_v26 = vmul.f32 5.9604645e-08, %v231_v20  ;;  %v188_v27 = vxor.u32 %v180_v43, %v172_v31  ;;  %v202_v57 = vadd.s32 1, %v194_v45  ;;  %v203_v59 = vadd.s32 1, %v195_v47 }
  0x32   :  { %v204_v28 = vadd.s32 1, %v196_v15  ;;  %v207_v60 = vcvt.s32.f32 %v199_v48  ;;  %v240_v29 = vmul.f32 5.9604645e-08, %v232_v49  ;;  %v189_v61 = vxor.u32 %v181_v44, %v173_v32 }
  0x33   :  { %v2318_v36 = vmul.f32 6.2831855, %v239_v26  ;;  %v190_v62 = vxor.u32 %v182_v50, %v174_v37  ;;  %v205_v63 = vadd.s32 1, %v197_v52  ;;  %v206_v1 = vadd.s32 1, %v198_v24 }
  0x34   :  { %v208_v30 = vcvt.s32.f32 %v200_v54  ;;  %v209_v2 = vcvt.s32.f32 %v201_v55  ;;  %v225_v3 = vshrl.u32 %v185_v51, 8  ;;  %v210_v4 = vcvt.s32.f32 %v202_v57 }
  0x35   :  { %v338_v46 = vand.u32 2139095040, %v2318_v36  ;;  %v226_v33 = vshrl.u32 %v186_v16, 8  ;;  %v227_v5 = vshrl.u32 %v187_v56, 8  ;;  %v211_v6 = vcvt.s32.f32 %v203_v59 }
  0x36   :  { %v212_v7 = vcvt.s32.f32 %v204_v28  ;;  %v215_v8 = vmul.f32 5.9604645e-08, %v207_v60  ;;  %v2328_v9 = vmul.f32 6.2831855, %v240_v29  ;;  %v228_v10 = vshrl.u32 %v188_v27, 8 }
  0x37   :  { %v339_v53 = vshrl.u32 %v338_v46, 23  ;;  %v229_v11 = vshrl.u32 %v189_v61, 8  ;;  %v230_v12 = vshrl.u32 %v190_v62, 8  ;;  %v213_v14 = vcvt.s32.f32 %v205_v63 }
  0x38   :  { %v216_v17 = vmul.f32 5.9604645e-08, %v208_v30  ;;  %v233_v18 = vcvt.s32.f32 %v225_v3  ;;  %v335_v19 = vand.u32 2147483647, %v2318_v36  ;;  %v214_v20 = vcvt.s32.f32 %v206_v1 }
  0x39   :  { %v2093_v58 = vadd.s32 4294967169, %v339_v53  ;;  %v234_v21 = vcvt.s32.f32 %v226_v33  ;;  %v235_v22 = vcvt.s32.f32 %v227_v5  ;;  %v3555_v23 = vand.u32 2147483647, %v2328_v9 }
  0x3a   :  { %v217_v25 = vmul.f32 5.9604645e-08, %v209_v2  ;;  %2195 = vlog2.f32 %v215_v8  ;;  %v441_v31 = vand.u32 2139095040, %v2328_v9  ;;  %v218_v32 = vmul.f32 5.9604645e-08, %v210_v4 }
  0x3b   :  { %v345_v0 = vadd.s32 1, %v2093_v58  ;;  %v236_v34 = vcvt.s32.f32 %v228_v10  ;;  %v237_v35 = vcvt.s32.f32 %v229_v11  ;;  %v238_v37 = vcvt.s32.f32 %v230_v12 }
  0x3c   :  { %v219_v38 = vmul.f32 5.9604645e-08, %v211_v6  ;;  %v241_v39 = vmul.f32 5.9604645e-08, %v233_v18  ;;  %2197 = vlog2.f32 %v216_v17  ;;  %v342_v40 = vand.u32 8388607, %v335_v19 }
  0x3d   :  { %vm346_vm0 = vcmp.gt.s32.totalorder %v345_v0, 0  ;;  %v220_v41 = vmul.f32 5.9604645e-08, %v212_v7  ;;  %v242_v42 = vmul.f32 5.9604645e-08, %v234_v21  ;;  %v243_v43 = vmul.f32 5.9604645e-08, %v235_v22 }
  0x3e   :  { %v347_v13 = vsel %vm346_vm0, %v345_v0, 0  ;;  %v445_v44 = vand.u32 8388607, %v3555_v23  ;;  %v221_v45 = vmul.f32 5.9604645e-08, %v213_v14  ;;  %2199 = vlog2.f32 %v217_v25 }
  0x3f   :  { %v349_v26 = vand.u32 31, %v347_v13  ;;  %v442_v47 = vshrl.u32 %v441_v31, 23  ;;  %v244_v15 = vmul.f32 5.9604645e-08, %v236_v34  ;;  %v245_v48 = vmul.f32 5.9604645e-08, %v237_v35 }
  0x40   :  { %v246_v49 = vmul.f32 5.9604645e-08, %v238_v37  ;;  %2201 = vlog2.f32 %v218_v32  ;;  %v222_v50 = vmul.f32 5.9604645e-08, %v214_v20  ;;  %v2337_v51 = vmul.f32 6.2831855, %v241_v39 }
  0x41   :  { %v350_v46 = vsub.s32 32, %v349_v26  ;;  %2203 = vlog2.f32 %v219_v38  ;;  %v343_v52 = vor.u32 8388608, %v342_v40  ;;  %v2339_v53 = vmul.f32 6.2831855, %v242_v42 }
  0x42   :  { %2205 = vlog2.f32 %v220_v41  ;;  %v2341_v16 = vmul.f32 6.2831855, %v243_v43  ;;  %v446_v24 = vor.u32 8388608, %v445_v44  ;;  %v3583_v54 = vmov 683565275  }
  0x43   :  { %v352_v55 = vshll.u32 %v3583_v54, %v349_v26  ;;  %v3571_v56 = vmov 2475754826   ;;  %v2097_v57 = vadd.s32 4294967169, %v442_v47  ;;  %v3554_v58 = vand.u32 2147483647, %v2337_v51 }
  0x44   :  { %v353_v27 = vshrl.u32 %v3571_v56, %v350_v46  ;;  %2207 = vlog2.f32 %v221_v45  ;;  %v2346_v59 = vmul.f32 6.2831855, %v244_v15  ;;  %v2348_v28 = vmul.f32 6.2831855, %v245_v48 }
  0x45   :  { %v2350_v60 = vmul.f32 6.2831855, %v246_v49  ;;  %2209 = vlog2.f32 %v222_v50  ;;  %v348_v29 = vshrl.u32 %v347_v13, 5  ;;  %v355_v61 = vshll.u32 %v3571_v56, %v349_v26 }
  0x46   :  { %v2353_v62 = vshll.u32 %v343_v52, 8  ;;  %v3573_v63 = vmov 2131351028   ;;  %v3568_v1 = vmov 2102212464   ;;  %v2357_v2 = vshll.u32 %v446_v24, 8 }
  0x47   :  { %v358_v0 = vshll.u32 %v3573_v63, %v349_v26  ;;  %v361_v30 = vshll.u32 %v3568_v1, %v349_v26  ;;  %v544_v3 = vand.u32 2139095040, %v2337_v51  ;;  %v354_v4 = vor.u32 %v353_v27, %v352_v55  ;;  %v2196_v7 = vpop.eup %2195 }
  0x48   :  { %v356_v33 = vshrl.u32 %v3573_v63, %v350_v46  ;;  %v448_v5 = vadd.s32 1, %v2097_v57  ;;  %v548_v6 = vand.u32 8388607, %v3554_v58  ;;  %v359_v8 = vshrl.u32 %v3568_v1, %v350_v46 }
  0x49   :  { %v3566_v10 = vmov 920167782   ;;  %v3559_v13 = vmov 1326507024   ;;  %v351_v17 = vshrl.u32 %v3583_v54, %v350_v46  ;;  %vm367_vm1 = vcmp.lt.s32.totalorder %v348_v29, 1  ;;  %v2198_v20 = vpop.eup %2197 }
  0x4a   :  { %v362_v11 = vshrl.u32 %v3566_v10, %v350_v46  ;;  %v364_v12 = vshll.u32 %v3566_v10, %v349_v26  ;;  %v365_v14 = vshrl.u32 %v3559_v13, %v350_v46  ;;  %v357_v18 = vor.u32 %v356_v33, %v355_v61 }
  0x4b   :  { %vm369_vm2 = vcmp.lt.s32.totalorder %v348_v29, 3  ;;  %v360_v21 = vor.u32 %v359_v8, %v358_v0  ;;  %vm370_vm3 = vcmp.lt.s32.totalorder %v348_v29, 4  ;;  %v248_v31 = vmul.f32 0.6931472, %v2196_v7  ;;  %v2200_v34 = vpop.eup %2199 }
  0x4c   :  { %v363_v22 = vor.u32 %v362_v11, %v361_v30  ;;  %v366_v25 = vor.u32 %v365_v14, %v364_v12  ;;  %vm368_vm4 = vcmp.lt.s32.totalorder %v348_v29, 2  ;;  %v375_v32 = vsel %vm367_vm1, %v354_v4, %v357_v18 }
  0x4d   :  { %vm449_vm5 = vcmp.gt.s32.totalorder %v448_v5, 0  ;;  %v372_v26 = vsel %vm370_vm3, %v360_v21, 2102212464  ;;  %v379_v37 = vsel %vm367_vm1, %v357_v18, %v360_v21  ;;  %v2202_v39 = vpop.eup %2201  ;;  %v250_v40 = vmul.f32 0.6931472, %v2198_v20 }
  0x4e   :  { %v376_v35 = vsel %vm370_vm3, %v363_v22, 920167782  ;;  %v380_v38 = vsel %vm370_vm3, %v366_v25, 1326507024  ;;  %v545_v42 = vshrl.u32 %v544_v3, 23  ;;  %v2204_v44 = vpop.eup %2203  ;;  %v371_v45 = vsel %vm367_vm1, %v351_v17, %v354_v4 }
  0x4f   :  { %v377_v41 = vsel %vm369_vm2, %v360_v21, %v376_v35  ;;  %v644_v43 = vand.u32 2147483647, %v2339_v53  ;;  %v373_v46 = vsel %vm369_vm2, %v357_v18, %v372_v26  ;;  %v381_v15 = vsel %vm369_vm2, %v363_v22, %v380_v38  ;;  %v2206_v48 = vpop.eup %2205 }
  0x50   :  { %v378_v47 = vsel %vm368_vm4, %v375_v32, %v377_v41  ;;  %v252_v49 = vmul.f32 0.6931472, %v2200_v34  ;;  %v382_v50 = vsel %vm368_vm4, %v379_v37, %v381_v15  ;;  %v450_v52 = vsel %vm449_vm5, %v448_v5, 0 }
  0x51   :  { %v549_v24 = vor.u32 8388608, %v548_v6  ;;  %v254_v55 = vmul.f32 0.6931472, %v2202_v39  ;;  %v2378_v27 = vmul.f32 -2.0, %v248_v31  ;;  %v2208_v0 = vpop.eup %2207  ;;  %v374_v30 = vsel %vm368_vm4, %v371_v45, %v373_v46 }
  0x52   :  { %v2381_v57 = vmul.u32.u64.low %v2353_v62, %v382_v50  ;;  %v2382_v61 = vmul.u32.u64.high %v2353_v62, %v382_v50, %v2381_v57  ;;  %v2386_v3 = vmul.u32.u64.low %v2353_v62, %v378_v47  ;;  %v2387_v4 = vmul.u32.u64.high %v2353_v62, %v378_v47, %v2386_v3  ;;  %v2210_v7 = vpop.eup %2209 }
  0x53   :  { %v647_v33 = vand.u32 2139095040, %v2339_v53  ;;  %v256_v5 = vmul.f32 0.6931472, %v2204_v44  ;;  %v2391_v6 = vmul.f32 -2.0, %v250_v40  ;;  %v452_v8 = vand.u32 31, %v450_v52 }
  0x54   :  { %v2394_v12 = vmul.f32 -2.0, %v252_v49  ;;  %v451_v14 = vshrl.u32 %v450_v52, 5  ;;  %v2101_v17 = vadd.s32 4294967169, %v545_v42  ;;  %v2396_v29 = vshll.u32 %v549_v24, 8 }
  0x55   :  { %v258_v18 = vmul.f32 0.6931472, %v2206_v48  ;;  %v2398_v20 = vmul.f32 -2.0, %v254_v55  ;;  %2211 = vrsqrt.f32 %v2378_v27  ;;  %v390_v21 = vmul.u32 %v2353_v62, %v374_v30 }
  0x56   :  { %v260_v22 = vmul.f32 0.6931472, %v2208_v0  ;;  %v276_v25 = vand.u32 2147483648, %v2378_v27  ;;  %vm392_vm6 = vc.u32 %v2382_v61, %v2386_v3  ;;  %v393_v31 = vadd.s32 1, %v2387_v4 }
  0x57   :  { %v2406_v32 = vmul.f32 -2.0, %v256_v5  ;;  %2213 = vrsqrt.f32 %v2391_v6  ;;  %v453_v34 = vsub.s32 32, %v452_v8  ;;  %v455_v26 = vshll.u32 %v3583_v54, %v452_v8 }
  0x58   :  { %v394_v35 = vsel %vm392_vm6, %v393_v31, %v2387_v4  ;;  %v458_v37 = vshll.u32 %v3571_v56, %v452_v8  ;;  %v461_v62 = vshll.u32 %v3573_v63, %v452_v8  ;;  %vm470_vm7 = vcmp.lt.s32.totalorder %v451_v14, 1 }
  0x59   :  { %v395_v38 = vadd.s32 %v394_v35, %v390_v21  ;;  %v454_v39 = vshrl.u32 %v3583_v54, %v453_v34  ;;  %v456_v40 = vshrl.u32 %v3571_v56, %v453_v34  ;;  %v459_v41 = vshrl.u32 %v3573_v63, %v453_v34 }
  0x5a   :  { %v462_v42 = vshrl.u32 %v3568_v1, %v453_v34  ;;  %v464_v44 = vshll.u32 %v3568_v1, %v452_v8  ;;  %v465_v45 = vshrl.u32 %v3566_v10, %v453_v34  ;;  %v467_v46 = vshll.u32 %v3566_v10, %v452_v8 }
  0x5b   :  { %v396_v47 = vadd.s32 536870912, %v395_v38  ;;  %v457_v15 = vor.u32 %v456_v40, %v455_v26  ;;  %v460_v48 = vor.u32 %v459_v41, %v458_v37  ;;  %v468_v49 = vshrl.u32 %v3559_v13, %v453_v34 }
  0x5c   :  { %v262_v50 = vmul.f32 0.6931472, %v2210_v7  ;;  %v463_v52 = vor.u32 %v462_v42, %v461_v62  ;;  %v466_v24 = vor.u32 %v465_v45, %v464_v44  ;;  %vm472_vm8 = vcmp.lt.s32.totalorder %v451_v14, 3 }
  0x5d   :  { %v2421_v55 = vshrl.u32 %v396_v47, 30  ;;  %v469_v57 = vor.u32 %v468_v49, %v467_v46  ;;  %vm471_vm9 = vcmp.lt.s32.totalorder %v451_v14, 2  ;;  %vm473_vm10 = vcmp.lt.s32.totalorder %v451_v14, 4 }
  0x5e   :  { %v474_v0 = vsel %vm470_vm7, %v454_v39, %v457_v15  ;;  %v475_v30 = vsel %vm473_vm10, %v463_v52, 2102212464  ;;  %v478_v4 = vsel %vm470_vm7, %v457_v15, %v460_v48  ;;  %v479_v5 = vsel %vm473_vm10, %v466_v24, 920167782 }
  0x5f   :  { %v398_v8 = vshll.u32 %v2421_v55, 30  ;;  %v476_v21 = vsel %vm472_vm8, %v460_v48, %v475_v30  ;;  %v480_v7 = vsel %vm472_vm8, %v463_v52, %v479_v5  ;;  %v482_v31 = vsel %vm470_vm7, %v460_v48, %v463_v52 }
  0x60   :  { %v2429_v34 = vmul.f32 -2.0, %v258_v18  ;;  %v481_v26 = vsel %vm471_vm9, %v478_v4, %v480_v7  ;;  %v483_v35 = vsel %vm473_vm10, %v469_v57, 1326507024  ;;  %v551_v37 = vadd.s32 1, %v2101_v17 }
  0x61   :  { %v2432_v62 = vmul.f32 -2.0, %v260_v22  ;;  %v283_v39 = vand.u32 2147483648, %v2391_v6  ;;  %v2435_v40 = vsub.s32 %v395_v38, %v398_v8  ;;  %v484_v41 = vsel %vm472_vm8, %v466_v24, %v483_v35 }
  0x62   :  { %v2212_v42 = vpop.eup %2211  ;;  %v477_v44 = vsel %vm471_vm9, %v474_v0, %v476_v21  ;;  %v485_v45 = vsel %vm471_vm9, %v482_v31, %v484_v41  ;;  %v2441_v18 = vmul.u32.u64.low %v2357_v2, %v481_v26  ;;  %v2442_v46 = vmul.u32.u64.high %v2357_v2, %v481_v26, %v2441_v18 }
  0x63   :  { %2215 = vrsqrt.f32 %v2394_v12  ;;  %v401_v17 = vsub.s32 0, %v2435_v40  ;;  %v2448_v22 = vmul.u32.u64.low %v2357_v2, %v485_v45  ;;  %v2449_v38 = vmul.u32.u64.high %v2357_v2, %v485_v45, %v2448_v22 }
  0x64   :  { %v2451_v47 = vpop.eup %2213  ;;  %v2453_v15 = vmul.f32 -2.0, %v262_v50  ;;  %2217 = vrsqrt.f32 %v2398_v20  ;;  %vm552_vm11 = vcmp.gt.s32.totalorder %v551_v37, 0  ;;  %v493_v52 = vmul.u32 %v2357_v2, %v477_v44 }
  0x65   :  { %2219 = vrsqrt.f32 %v2406_v32  ;;  %v2094_v49 = vmin.u32 %v401_v17, %v2435_v40  ;;  %v496_v57 = vadd.s32 1, %v2442_v46  ;;  %v553_v0 = vsel %vm552_vm11, %v551_v37, 0 }
  0x66   :  { %3589 = vst [vmem:[#allocation5_spill] sm:$0xff] %v2453_v15  ;;  %v648_v50 = vshrl.u32 %v647_v33, 23  ;;  %2221 = vrsqrt.f32 %v2429_v34  ;;  %vm495_vm12 = vc.u32 %v2449_v38, %v2441_v18  ;;  %v555_v8 = vand.u32 31, %v553_v0 }
  0x67   :  { %v403_v4 = vclz %v2094_v49  ;;  %2223 = vrsqrt.f32 %v2432_v62  ;;  %v497_v5 = vsel %vm495_vm12, %v496_v57, %v2442_v46  ;;  %v2473_v21 = vmul.f32 %v2212_v42, %v2378_v27 }
  0x68   :  { %2225 = vrsqrt.f32 %v2453_v15  ;;  %v498_v7 = vadd.s32 %v497_v5, %v493_v52  ;;  %v391_v31 = vadd.s32 %v2386_v3, %v2382_v61  ;;  %v2478_v26 = vshrl.u32 %v553_v0, 5 }
  0x69   :  { %v2095_v33 = vadd.s32 4294967294, %v403_v4  ;;  %v556_v35 = vsub.s32 32, %v555_v8  ;;  %v2105_v37 = vadd.s32 4294967169, %v648_v50  ;;  %v558_v44 = vshll.u32 %v3583_v54, %v555_v8 }
  0x6a   :  { %v499_v41 = vadd.s32 536870912, %v498_v7  ;;  %v561_v45 = vshll.u32 %v3571_v56, %v555_v8  ;;  %vm273_vm14 = vcmp.eq.f32.partialorder %v2378_v27, inf  ;;  %v567_v22 = vshll.u32 %v3568_v1, %v555_v8 }
  0x6b   :  { %vm2096_vm13 = vcmp.lt.s32.totalorder %v2095_v33, 0  ;;  %v559_v46 = vshrl.u32 %v3571_v56, %v556_v35  ;;  %v562_v17 = vshrl.u32 %v3573_v63, %v556_v35  ;;  %vm280_vm15 = vcmp.eq.f32.partialorder %v2391_v6, inf }
  0x6c   :  { %v406_v42 = vsel %vm2096_vm13, 0, %v2095_v33  ;;  %v2488_v52 = vshrl.u32 %v499_v41, 30  ;;  %v564_v57 = vshll.u32 %v3573_v63, %v555_v8  ;;  %v565_v0 = vshrl.u32 %v3568_v1, %v556_v35 }
  0x6d   :  { %v407_v61 = vsub.s32 32, %v406_v42  ;;  %v408_v3 = vshll.u32 %v2435_v40, %v406_v42  ;;  %v411_v49 = vsub.s32 4294967266, %v406_v42  ;;  %v568_v50 = vshrl.u32 %v3566_v10, %v556_v35 }
  0x6e   :  { %v570_v4 = vshll.u32 %v3566_v10, %v555_v8  ;;  %v501_v2 = vshll.u32 %v2488_v52, 30  ;;  %vm573_vm0 = vcmp.lt.s32.totalorder %v2478_v26, 1  ;;  %vm275_vm1 = vcmp.eq.f32.partialorder %v2378_v27, 0.0 }
  0x6f   :  { %v409_v5 = vshrl.u32 %v391_v31, %v407_v61  ;;  %v412_v33 = vadd.s32 127, %v411_v49  ;;  %v560_v40 = vor.u32 %v559_v46, %v558_v44  ;;  %v563_v41 = vor.u32 %v562_v17, %v561_v45 }
  0x70   :  { %v2216_v11 = vpop.eup %2215  ;;  %v569_v42 = vor.u32 %v568_v50, %v567_v22  ;;  %v571_v58 = vshrl.u32 %v3559_v13, %v556_v35  ;;  %v2498_v48 = vsub.s32 %v498_v7, %v501_v2  ;;  %v557_v8 = vshrl.u32 %v3583_v54, %v556_v35 }
  0x71   :  { %v2218_v30 = vpop.eup %2217  ;;  %v410_v24 = vor.u32 %v409_v5, %v408_v3  ;;  %v413_v23 = vshll.u32 %v412_v33, 23  ;;  %v279_v61 = vmul.f32 %v2451_v47, %v2391_v6  ;;  %vm282_vm2 = vcmp.eq.f32.partialorder %v2391_v6, 0.0 }
  0x72   :  { %v2220_v31 = vpop.eup %2219  ;;  %v566_v49 = vor.u32 %v565_v0, %v564_v57  ;;  %v572_v14 = vor.u32 %v571_v58, %v570_v4  ;;  %vm576_vm3 = vcmp.lt.s32.totalorder %v2478_v26, 4  ;;  %vm287_vm4 = vcmp.eq.f32.partialorder %v2394_v12, inf }
  0x73   :  { %v414_v44 = vor.u32 4788187, %v413_v23  ;;  %v417_v45 = vcvt.s32.f32 %v410_v24  ;;  %v504_v46 = vsub.s32 0, %v2498_v48  ;;  %vm575_vm5 = vcmp.lt.s32.totalorder %v2478_v26, 3  ;;  %v2508_v2 = vpop.eup %2221 }
  0x74   :  { %vm337_vm6 = vcmp.lt.s32.totalorder %v2318_v36, 0  ;;  %vm574_vm7 = vcmp.lt.s32.totalorder %v2478_v26, 2  ;;  %v578_v47 = vsel %vm576_vm3, %v566_v49, 2102212464  ;;  %v581_v58 = vsel %vm573_vm0, %v560_v40, %v563_v41  ;;  %v2518_v24 = vpop.eup %2223 }
  0x75   :  { %v582_v23 = vsel %vm576_vm3, %v569_v42, 920167782  ;;  %v415_v7 = vand.u32 2147483647, %v414_v44  ;;  %v2098_v35 = vmin.u32 %v504_v46, %v2498_v48  ;;  %v577_v17 = vsel %vm573_vm0, %v557_v8, %v560_v40  ;;  %v2523_v3 = vpop.eup %2225 }
  0x76   :  { %v654_v22 = vadd.s32 1, %v2105_v37  ;;  %3590 = vst [vmem:[#allocation6_spill] sm:$0xff] %v2523_v3  ;;  %v579_v57 = vsel %vm575_vm5, %v563_v41, %v578_v47  ;;  %v583_v0 = vsel %vm575_vm5, %v566_v49, %v582_v23  ;;  %v585_v50 = vsel %vm573_vm0, %v563_v41, %v566_v49 }
  0x77   :  { %v586_v4 = vsel %vm576_vm3, %v572_v14, 1326507024  ;;  %v274_v5 = vsel %vm273_vm14, %v2378_v27, %v2473_v21  ;;  %v418_v37 = vmul.f32 %v417_v45, %v415_v7  ;;  %v506_v33 = vclz %v2098_v35 }
  0x78   :  { %v584_v40 = vsel %vm574_vm7, %v581_v58, %v583_v0  ;;  %v281_v8 = vsel %vm280_vm15, %v2391_v6, %v279_v61  ;;  %vm294_vm8 = vcmp.eq.f32.partialorder %v2398_v20, inf  ;;  %vm2545_vm9 = vcmp.le.f32.partialorder %v335_v19, 0.7853982 }
  0x79   :  { %v587_v21 = vsel %vm575_vm5, %v569_v42, %v586_v4  ;;  %v2552_v41 = vmul.u32.u64.low %v2396_v29, %v584_v40  ;;  %v2553_v49 = vmul.u32.u64.high %v2396_v29, %v584_v40, %v2552_v41  ;;  %v2099_v44 = vadd.s32 4294967294, %v506_v33 }
  0x7a   :  { %v580_v61 = vsel %vm574_vm7, %v577_v17, %v579_v57  ;;  %v588_v45 = vsel %vm574_vm7, %v585_v50, %v587_v21  ;;  %vm655_vm10 = vcmp.gt.s32.totalorder %v654_v22, 0  ;;  %v286_v19 = vmul.f32 %v2216_v11, %v2394_v12 }
  0x7b   :  { %v2562_v46 = vmul.u32.u64.low %v2396_v29, %v588_v45  ;;  %v2563_v47 = vmul.u32.u64.high %v2396_v29, %v588_v45, %v2562_v46  ;;  %v656_v42 = vsel %vm655_vm10, %v654_v22, 0  ;;  %v2569_v58 = vsel %vm275_vm1, %v276_v25, %v274_v5 }
  0x7c   :  { %v419_v23 = vxor.u32 2147483648, %v418_v37  ;;  %vm2100_vm11 = vcmp.lt.s32.totalorder %v2099_v44, 0  ;;  %v658_v7 = vand.u32 31, %v656_v42  ;;  %v494_v26 = vadd.s32 %v2441_v18, %v2449_v38 }
  0x7d   :  { %v509_v35 = vsel %vm2100_vm11, 0, %v2099_v44  ;;  %v596_v11 = vmul.u32 %v2396_v29, %v580_v61  ;;  %v599_v17 = vadd.s32 1, %v2553_v49  ;;  %v2579_v22 = vsel %vm282_vm2, %v283_v39, %v281_v8 }
  0x7e   :  { %v293_v27 = vmul.f32 %v2218_v30, %v2398_v20  ;;  %v510_v25 = vsub.s32 32, %v509_v35  ;;  %v514_v57 = vsub.s32 4294967266, %v509_v35  ;;  %v288_v0 = vsel %vm287_vm4, %v2394_v12, %v286_v19 }
  0x7f   :  { %v2586_v18 = vmul.f32 %v2220_v31, %v2406_v32  ;;  %vm598_vm12 = vc.u32 %v2563_v47, %v2552_v41  ;;  %v659_v29 = vsub.s32 32, %v658_v7  ;;  %v420_v6 = vsel %vm337_vm6, %v419_v23, %v418_v37 }
  0x80   :  { %v515_v39 = vadd.s32 127, %v514_v57  ;;  %v600_v38 = vsel %vm598_vm12, %v599_v17, %v2553_v49  ;;  %v2593_v30 = vshrl.u32 %v656_v42, 5  ;;  %vm289_vm13 = vcmp.eq.f32.partialorder %v2394_v12, 0.0 }
  0x81   :  { %v511_v50 = vshll.u32 %v2498_v48, %v509_v35  ;;  %v512_v4 = vshrl.u32 %v494_v26, %v510_v25  ;;  %v601_v5 = vadd.s32 %v600_v38, %v596_v11  ;;  %v661_v31 = vshll.u32 %v3583_v54, %v658_v7 }
  0x82   :  { %v662_v33 = vshrl.u32 %v3571_v56, %v659_v29  ;;  %v664_v40 = vshll.u32 %v3571_v56, %v658_v7  ;;  %v665_v8 = vshrl.u32 %v3573_v63, %v659_v29  ;;  %v667_v37 = vshll.u32 %v3573_v63, %v658_v7 }
  0x83   :  { %vm296_vm14 = vcmp.eq.f32.partialorder %v2398_v20, 0.0  ;;  %vm301_vm15 = vcmp.eq.f32.partialorder %v2406_v32, inf  ;;  %v516_v21 = vshll.u32 %v515_v39, 23  ;;  %v602_v49 = vadd.s32 536870912, %v601_v5 }
  0x84   :  { %v668_v48 = vshrl.u32 %v3568_v1, %v659_v29  ;;  %v670_v44 = vshll.u32 %v3568_v1, %v658_v7  ;;  %v295_v61 = vsel %vm294_vm8, %v2398_v20, %v293_v27  ;;  %v423_v45 = vsel %vm2545_vm9, %v2318_v36, %v420_v6 }
  0x85   :  { %v651_v19 = vand.u32 8388607, %v644_v43  ;;  %v671_v46 = vshrl.u32 %v3566_v10, %v659_v29  ;;  %v513_v42 = vor.u32 %v512_v4, %v511_v50  ;;  %v2615_v23 = vshrl.u32 %v602_v49, 30 }
  0x86   :  { %v673_v26 = vshll.u32 %v3566_v10, %v658_v7  ;;  %v674_v35 = vshrl.u32 %v3559_v13, %v659_v29  ;;  %v663_v11 = vor.u32 %v662_v33, %v661_v31  ;;  %v666_v17 = vor.u32 %v665_v8, %v664_v40 }
  0x87   :  { %v669_v25 = vor.u32 %v668_v48, %v667_v37  ;;  %v672_v27 = vor.u32 %v671_v46, %v670_v44  ;;  %vm303_vm0 = vcmp.eq.f32.partialorder %v2406_v32, 0.0  ;;  %vm308_vm1 = vcmp.eq.f32.partialorder %v2429_v34, inf }
  0x88   :  { %v517_v57 = vor.u32 4788187, %v516_v21  ;;  %v604_v6 = vshll.u32 %v2615_v23, 30  ;;  %vm676_vm2 = vcmp.lt.s32.totalorder %v2593_v30, 1  ;;  %vm678_vm3 = vcmp.lt.s32.totalorder %v2593_v30, 3 }
  0x89   :  { %2227 = vcosq.f32 %v423_v45  ;;  %v652_v39 = vor.u32 8388608, %v651_v19  ;;  %v675_v7 = vor.u32 %v674_v35, %v673_v26  ;;  %vm679_vm4 = vcmp.lt.s32.totalorder %v2593_v30, 4 }
  0x8a   :  { %v421_v38 = vsub.s32 4, %v2421_v55  ;;  %2229 = vsinq.f32 %v423_v45  ;;  %v2626_v50 = vsub.s32 %v601_v5, %v604_v6  ;;  %v685_v4 = vsel %vm679_vm4, %v672_v27, 920167782 }
  0x8b   :  { %v660_v31 = vshrl.u32 %v3583_v54, %v659_v29  ;;  %vm677_vm5 = vcmp.lt.s32.totalorder %v2593_v30, 2  ;;  %v684_v33 = vsel %vm676_vm2, %v663_v11, %v666_v17  ;;  %v686_v40 = vsel %vm678_vm3, %v669_v25, %v685_v4 }
  0x8c   :  { %vm310_vm7 = vcmp.eq.f32.partialorder %v2429_v34, 0.0  ;;  %v518_v8 = vand.u32 2147483647, %v517_v57  ;;  %v520_v37 = vcvt.s32.f32 %v513_v42  ;;  %v607_v5 = vsub.s32 0, %v2626_v50 }
  0x8d   :  { %v681_v21 = vsel %vm679_vm4, %v669_v25, 2102212464  ;;  %v3593_v49 = vand.u32 2147483648, %v2394_v12  ;;  %v307_v48 = vmul.f32 %v2508_v2, %v2429_v34  ;;  %vm315_vm8 = vcmp.eq.f32.partialorder %v2432_v62, inf }
  0x8e   :  { %v689_v44 = vsel %vm679_vm4, %v675_v7, 1326507024  ;;  %v692_v45 = vshll.u32 %v652_v39, 8  ;;  %v422_v19 = vsel %vm337_vm6, %v421_v38, %v2421_v55  ;;  %v2102_v46 = vmin.u32 %v607_v5, %v2626_v50 }
  0x8f   :  { %v2644_v29 = vsel %vm289_vm13, %v3593_v49, %v288_v0  ;;  %v687_v12 = vsel %vm677_vm5, %v684_v33, %v686_v40  ;;  %v688_v0 = vsel %vm676_vm2, %v666_v17, %v669_v25  ;;  %v3594_v2 = vand.u32 2147483648, %v2398_v20 }
  0x90   :  { %v302_v26 = vsel %vm301_vm15, %v2406_v32, %v2586_v18  ;;  %vm440_vm6 = vcmp.lt.s32.totalorder %v2328_v9, 0  ;;  %v680_v55 = vsel %vm676_vm2, %v660_v31, %v663_v11  ;;  %v682_v35 = vsel %vm678_vm3, %v666_v17, %v681_v21 }
  0x91   :  { %v2663_v42 = vsel %vm296_vm14, %v3594_v2, %v295_v61  ;;  %v314_v25 = vmul.f32 %v2518_v24, %v2432_v62  ;;  %v521_v57 = vmul.f32 %v520_v37, %v518_v8  ;;  %v609_v20 = vclz %v2102_v46 }
  0x92   :  { %v690_v61 = vsel %vm678_vm3, %v672_v27, %v689_v44  ;;  %v2680_v6 = vsel %vm2545_vm9, 0, %v422_v19  ;;  %v2684_v39 = vmul.u32.u64.low %v692_v45, %v687_v12  ;;  %v2685_v11 = vmul.u32.u64.high %v692_v45, %v687_v12, %v2684_v39 }
  0x93   :  { %v691_v18 = vsel %vm677_vm5, %v688_v0, %v690_v61  ;;  %v3595_v17 = vand.u32 2147483647, %v2328_v9  ;;  %vm543_vm11 = vcmp.lt.s32.totalorder %v2337_v51, 0  ;;  %v2103_v27 = vadd.s32 4294967294, %v609_v20 }
  0x94   :  { %v683_v14 = vsel %vm677_vm5, %v680_v55, %v682_v35  ;;  %v2697_v7 = vmul.u32.u64.low %v692_v45, %v691_v18  ;;  %v2698_v38 = vmul.u32.u64.high %v692_v45, %v691_v18, %v2697_v7  ;;  %v3598_v4 = vand.u32 2147483648, %v2406_v32 }
  0x95   :  { %vm2690_vm10 = vcmp.le.f32.partialorder %v3595_v17, 0.7853982  ;;  %v309_v33 = vsel %vm308_vm1, %v2429_v34, %v307_v48  ;;  %v2710_v40 = vand.u32 3, %v2680_v6  ;;  %v750_v8 = vand.u32 2139095040, %v2341_v16 }
  0x96   :  { %v2704_v31 = vsel %vm303_vm0, %v3598_v4, %v302_v26  ;;  %vm317_vm9 = vcmp.eq.f32.partialorder %v2432_v62, 0.0  ;;  %v522_v30 = vxor.u32 2147483648, %v521_v57  ;;  %v524_v37 = vsub.s32 4, %v2488_v52  ;;  %v2718_v48 = vpop.eup %2227 }
  0x97   :  { %v597_v5 = vadd.s32 %v2552_v41, %v2563_v47  ;;  %vm2104_vm12 = vcmp.lt.s32.totalorder %v2103_v27, 0  ;;  %v699_v21 = vmul.u32 %v692_v45, %v683_v14  ;;  %v702_v49 = vadd.s32 1, %v2685_v11  ;;  %v2722_v2 = vpop.eup %2229 }
  0x98   :  { %v612_v32 = vsel %vm2104_vm12, 0, %v2103_v27  ;;  %v751_v44 = vshrl.u32 %v750_v8, 23  ;;  %v853_v0 = vand.u32 2139095040, %v2346_v59  ;;  %v3599_v26 = vand.u32 2147483648, %v2429_v34 }
  0x99   :  { %v613_v19 = vsub.s32 32, %v612_v32  ;;  %v614_v46 = vshll.u32 %v2626_v50, %v612_v32  ;;  %v617_v12 = vsub.s32 4294967266, %v612_v32  ;;  %v3601_v47 = vand.u32 2147483647, %v2337_v51 }
  0x9a   :  { %v2728_v41 = vsel %vm310_vm7, %v3599_v26, %v309_v33  ;;  %v627_v55 = vsub.s32 4, %v2615_v23  ;;  %vm701_vm14 = vc.u32 %v2698_v38, %v2684_v39  ;;  %v2109_v50 = vadd.s32 4294967169, %v751_v44 }
  0x9b   :  { %3600 = vst [vmem:[#allocation7_spill] sm:$0xff] %v2728_v41  ;;  %vm2732_vm13 = vcmp.le.f32.partialorder %v3601_v47, 0.7853982  ;;  %v316_v35 = vsel %vm315_vm8, %v2432_v62, %v314_v25  ;;  %v615_v20 = vshrl.u32 %v597_v5, %v613_v19  ;;  %v618_v34 = vadd.s32 127, %v617_v12 }
  0x9c   :  { %v703_v61 = vsel %vm701_vm14, %v702_v49, %v2685_v11  ;;  %vm433_vm15 = vcmp.eq.s32.totalorder %v2710_v40, 2  ;;  %v525_v18 = vsel %vm440_vm6, %v524_v37, %v2488_v52  ;;  %v757_v27 = vadd.s32 1, %v2109_v50 }
  0x9d   :  { %v704_v17 = vadd.s32 %v703_v61, %v699_v21  ;;  %v523_v14 = vsel %vm440_vm6, %v522_v30, %v521_v57  ;;  %v616_v7 = vor.u32 %v615_v20, %v614_v46  ;;  %v619_v4 = vshll.u32 %v618_v34, 23 }
  0x9e   :  { %v854_v33 = vshrl.u32 %v853_v0, 23  ;;  %v3556_v25 = vxor.u32 2147483648, %v2718_v48  ;;  %v628_v11 = vsel %vm543_vm11, %v627_v55, %v2615_v23  ;;  %vm758_vm0 = vcmp.gt.s32.totalorder %v757_v27, 0 }
  0x9f   :  { %v705_v8 = vadd.s32 536870912, %v704_v17  ;;  %v3557_v5 = vxor.u32 2147483648, %v2722_v2  ;;  %v620_v32 = vor.u32 4788187, %v619_v4  ;;  %v623_v52 = vcvt.s32.f32 %v616_v7 }
  0xa0   :  { %v759_v37 = vsel %vm758_vm0, %v757_v27, 0  ;;  %v526_v57 = vsel %vm2690_vm10, %v2328_v9, %v523_v14  ;;  %v3604_v21 = vand.u32 2147483647, %v2341_v16  ;;  %vm430_vm1 = vcmp.eq.s32.totalorder %v2710_v40, 0 }
  0xa1   :  { %v2757_v30 = vshrl.u32 %v705_v8, 30  ;;  %v761_v44 = vand.u32 31, %v759_v37  ;;  %v2764_v23 = vsel %vm2690_vm10, 0, %v525_v18  ;;  %v621_v19 = vand.u32 2147483647, %v620_v32 }
  0xa2   :  { %v754_v49 = vand.u32 8388607, %v3604_v21  ;;  %v2113_v46 = vadd.s32 4294967169, %v854_v33  ;;  %v3605_v12 = vand.u32 2147483648, %v2432_v62  ;;  %v2773_v26 = vand.u32 3, %v2764_v23 }
  0xa3   :  { %v707_v47 = vshll.u32 %v2757_v30, 30  ;;  %v762_v55 = vsub.s32 32, %v761_v44  ;;  %v2781_v24 = vsel %vm433_vm15, %v3556_v25, %v2722_v2  ;;  %2231 = vcosq.f32 %v526_v57 }
  0xa4   :  { %v2770_v0 = vsel %vm317_vm9, %v3605_v12, %v316_v35  ;;  %v624_v50 = vmul.f32 %v623_v52, %v621_v19  ;;  %v2785_v62 = vsel %vm2732_vm13, 0, %v628_v11  ;;  %v2790_v35 = vsel %vm430_vm1, %v2718_v48, %v3557_v5 }
  0xa5   :  { %3606 = vst [vmem:[#allocation8_spill] sm:$0xff] %v2770_v0  ;;  %v2792_v20 = vsub.s32 %v704_v17, %v707_v47  ;;  %v755_v34 = vor.u32 8388608, %v754_v49  ;;  %v3558_v61 = vand.u32 2147483647, %v2346_v59  ;;  %v764_v18 = vshll.u32 %v3583_v54, %v761_v44 }
  0xa6   :  { %v765_v27 = vshrl.u32 %v3571_v56, %v762_v55  ;;  %v767_v14 = vshll.u32 %v3571_v56, %v761_v44  ;;  %v860_v7 = vadd.s32 1, %v2113_v46  ;;  %2233 = vsinq.f32 %v526_v57 }
  0xa7   :  { %v710_v4 = vsub.s32 0, %v2792_v20  ;;  %v768_v33 = vshrl.u32 %v3573_v63, %v762_v55  ;;  %v770_v11 = vshll.u32 %v3573_v63, %v761_v44  ;;  %v625_v8 = vxor.u32 2147483648, %v624_v50 }
  0xa8   :  { %v700_v17 = vadd.s32 %v2684_v39, %v2698_v38  ;;  %v760_v32 = vshrl.u32 %v759_v37, 5  ;;  %v771_v52 = vshrl.u32 %v3568_v1, %v762_v55  ;;  %v773_v49 = vshll.u32 %v3568_v1, %v761_v44 }
  0xa9   :  { %v2106_v21 = vmin.u32 %v710_v4, %v2792_v20  ;;  %v2806_v19 = vshll.u32 %v755_v34, 8  ;;  %v2810_v57 = vand.u32 8388607, %v3558_v61  ;;  %vm429_vm2 = vcmp.lt.s32.totalorder %v2710_v40, 2 }
  0xaa   :  { %v763_v46 = vshrl.u32 %v3583_v54, %v762_v55  ;;  %v766_v12 = vor.u32 %v765_v27, %v764_v18  ;;  %v769_v47 = vor.u32 %v768_v33, %v767_v14  ;;  %vm861_vm3 = vcmp.gt.s32.totalorder %v860_v7, 0 }
  0xab   :  { %v712_v39 = vclz %v2106_v21  ;;  %v772_v38 = vor.u32 %v771_v52, %v770_v11  ;;  %v774_v37 = vshrl.u32 %v3566_v10, %v762_v55  ;;  %v776_v4 = vshll.u32 %v3566_v10, %v761_v44 }
  0xac   :  { %v626_v34 = vsel %vm543_vm11, %v625_v8, %v624_v50  ;;  %v777_v25 = vshrl.u32 %v3559_v13, %v762_v55  ;;  %vm779_vm4 = vcmp.lt.s32.totalorder %v760_v32, 1  ;;  %vm780_vm5 = vcmp.lt.s32.totalorder %v760_v32, 2 }
  0xad   :  { %v2107_v5 = vadd.s32 4294967294, %v712_v39  ;;  %v775_v61 = vor.u32 %v774_v37, %v773_v49  ;;  %vm781_vm7 = vcmp.lt.s32.totalorder %v760_v32, 3  ;;  %vm782_vm8 = vcmp.lt.s32.totalorder %v760_v32, 4 }
  0xae   :  { %v778_v18 = vor.u32 %v777_v25, %v776_v4  ;;  %v783_v27 = vsel %vm779_vm4, %v763_v46, %v766_v12  ;;  %v784_v14 = vsel %vm782_vm8, %v772_v38, 2102212464  ;;  %v787_v33 = vsel %vm779_vm4, %v766_v12, %v769_v47 }
  0xaf   :  { %vm2108_vm6 = vcmp.lt.s32.totalorder %v2107_v5, 0  ;;  %v785_v11 = vsel %vm781_vm7, %v769_v47, %v784_v14  ;;  %v788_v52 = vsel %vm782_vm8, %v775_v61, 920167782  ;;  %v791_v44 = vsel %vm779_vm4, %v769_v47, %v772_v38 }
  0xb0   :  { %v715_v21 = vsel %vm2108_vm6, 0, %v2107_v5  ;;  %v789_v50 = vsel %vm781_vm7, %v772_v38, %v788_v52  ;;  %v792_v8 = vsel %vm782_vm8, %v778_v18, 1326507024  ;;  %v862_v55 = vsel %vm861_vm3, %v860_v7, 0  ;;  %v2822_v13 = vpop.eup %2231 }
  0xb1   :  { %v716_v49 = vsub.s32 32, %v715_v21  ;;  %v717_v39 = vshll.u32 %v2792_v20, %v715_v21  ;;  %v720_v25 = vsub.s32 4294967266, %v715_v21  ;;  %v790_v46 = vsel %vm780_vm5, %v787_v33, %v789_v50 }
  0xb2   :  { %v629_v12 = vsel %vm2732_vm13, %v2337_v51, %v626_v34  ;;  %v793_v47 = vsel %vm781_vm7, %v775_v61, %v792_v8  ;;  %v2831_v5 = vmul.u32.u64.low %v2806_v19, %v790_v46  ;;  %v2832_v38 = vmul.u32.u64.high %v2806_v19, %v790_v46, %v2831_v5 }
  0xb3   :  { %v718_v7 = vshrl.u32 %v700_v17, %v716_v49  ;;  %v721_v37 = vadd.s32 127, %v720_v25  ;;  %v786_v4 = vsel %vm780_vm5, %v783_v27, %v785_v11  ;;  %v794_v20 = vsel %vm780_vm5, %v791_v44, %v793_v47  ;;  %v2837_v18 = vpop.eup %2233 }
  0xb4   :  { %vm536_vm10 = vcmp.eq.s32.totalorder %v2773_v26, 2  ;;  %v2841_v45 = vand.u32 3, %v2785_v62  ;;  %vm646_vm11 = vcmp.lt.s32.totalorder %v2339_v53, 0  ;;  %v864_v14 = vand.u32 31, %v862_v55 }
  0xb5   :  { %v2845_v61 = vmul.u32.u64.low %v2806_v19, %v794_v20  ;;  %v2846_v34 = vmul.u32.u64.high %v2806_v19, %v794_v20, %v2845_v61  ;;  %v2852_v17 = vsel %vm429_vm2, %v2790_v35, %v2781_v24  ;;  %vm2856_vm9 = vcmp.le.f32.partialorder %v644_v43, 0.7853982 }
  0xb6   :  { %v719_v27 = vor.u32 %v718_v7, %v717_v39  ;;  %v722_v33 = vshll.u32 %v721_v37, 23  ;;  %v3565_v11 = vand.u32 2147483647, %v2348_v28  ;;  %2235 = vcosq.f32 %v629_v12 }
  0xb7   :  { %v802_v52 = vmul.u32 %v2806_v19, %v786_v4  ;;  %v805_v44 = vadd.s32 1, %v2832_v38  ;;  %v865_v21 = vsub.s32 32, %v864_v14  ;;  %2237 = vsinq.f32 %v629_v12 }
  0xb8   :  { %v723_v40 = vor.u32 4788187, %v722_v33  ;;  %v726_v24 = vcvt.s32.f32 %v719_v27  ;;  %v858_v35 = vor.u32 8388608, %v2810_v57  ;;  %vm804_vm12 = vc.u32 %v2846_v34, %v2831_v5 }
  0xb9   :  { %v2866_v43 = vshrl.u32 %v862_v55, 5  ;;  %v867_v50 = vshll.u32 %v3583_v54, %v864_v14  ;;  %v870_v8 = vshll.u32 %v3571_v56, %v864_v14  ;;  %vm533_vm13 = vcmp.eq.s32.totalorder %v2773_v26, 0 }
  0xba   :  { %v724_v19 = vand.u32 2147483647, %v723_v40  ;;  %v806_v49 = vsel %vm804_vm12, %v805_v44, %v2832_v38  ;;  %v868_v39 = vshrl.u32 %v3571_v56, %v865_v21  ;;  %v876_v25 = vshll.u32 %v3568_v1, %v864_v14 }
  0xbb   :  { %v807_v46 = vadd.s32 %v806_v49, %v802_v52  ;;  %v871_v57 = vshrl.u32 %v3573_v63, %v865_v21  ;;  %v873_v12 = vshll.u32 %v3573_v63, %v864_v14  ;;  %v874_v55 = vshrl.u32 %v3568_v1, %v865_v21 }
  0xbc   :  { %v3562_v47 = vxor.u32 2147483648, %v2837_v18  ;;  %v3561_v7 = vxor.u32 2147483648, %v2822_v13  ;;  %v727_v37 = vmul.f32 %v726_v24, %v724_v19  ;;  %v877_v4 = vshrl.u32 %v3566_v10, %v865_v21 }
  0xbd   :  { %v808_v20 = vadd.s32 536870912, %v807_v46  ;;  %v866_v38 = vshrl.u32 %v3583_v54, %v865_v21  ;;  %v869_v61 = vor.u32 %v868_v39, %v867_v50  ;;  %vm882_vm14 = vcmp.lt.s32.totalorder %v2866_v43, 1 }
  0xbe   :  { %vm427_vm15 = vweird.f32 %v2318_v36  ;;  %vm532_vm0 = vcmp.lt.s32.totalorder %v2773_v26, 2  ;;  %v728_v27 = vxor.u32 2147483648, %v727_v37  ;;  %v872_v33 = vor.u32 %v871_v57, %v870_v8  ;;  %v2018_v36 = vld [vmem:[%s3552_s3 + $0x58] sm:$0xff] }
  0xbf   :  { %v878_v52 = vor.u32 %v877_v4, %v876_v25  ;;  %v879_v44 = vshll.u32 %v3566_v10, %v864_v14  ;;  %v2885_v40 = vshrl.u32 %v808_v20, 30  ;;  %v875_v24 = vor.u32 %v874_v55, %v873_v12 }
  0xc0   :  { %v3609_v19 = vmov 1326507024   ;;  %vm885_vm1 = vcmp.lt.s32.totalorder %v2866_v43, 4  ;;  %v538_v50 = vsel %vm536_vm10, %v3561_v7, %v2837_v18  ;;  %vm639_vm2 = vcmp.eq.s32.totalorder %v2841_v45, 2 }
  0xc1   :  { %v880_v49 = vshrl.u32 %v3609_v19, %v865_v21  ;;  %v729_v8 = vsel %vm646_vm11, %v728_v27, %v727_v37  ;;  %vm884_vm3 = vcmp.lt.s32.totalorder %v2866_v43, 3  ;;  %v898_v14 = vshll.u32 %v858_v35, 8 }
  0xc2   :  { %vm636_vm4 = vcmp.eq.s32.totalorder %v2841_v45, 0  ;;  %v732_v21 = vsel %vm2856_vm9, %v2339_v53, %v729_v8  ;;  %v810_v39 = vshll.u32 %v2885_v40, 30  ;;  %v887_v57 = vsel %vm885_vm1, %v875_v24, 2102212464 }
  0xc3   :  { %v881_v25 = vor.u32 %v880_v49, %v879_v44  ;;  %v730_v12 = vsub.s32 4, %v2757_v30  ;;  %vm883_vm5 = vcmp.lt.s32.totalorder %v2866_v43, 2  ;;  %v890_v55 = vsel %vm882_vm14, %v869_v61, %v872_v33  ;;  %v2917_v27 = vpop.eup %2235 }
  0xc4   :  { %v891_v35 = vsel %vm885_vm1, %v878_v52, 920167782  ;;  %2239 = vcosq.f32 %v732_v21  ;;  %v2911_v37 = vsub.s32 %v807_v46, %v810_v39  ;;  %v886_v4 = vsel %vm882_vm14, %v866_v38, %v869_v61  ;;  %3610 = vst [vmem:[#allocation9_spill] sm:$0xff] %v2917_v27  ;;  %v2926_v8 = vpop.eup %2237 }
  0xc5   :  { %v894_v20 = vsel %vm882_vm14, %v872_v33, %v875_v24  ;;  %2241 = vsinq.f32 %v732_v21  ;;  %vm749_vm7 = vcmp.lt.s32.totalorder %v2341_v16, 0  ;;  %v888_v44 = vsel %vm884_vm3, %v872_v33, %v887_v57 }
  0xc6   :  { %v892_v49 = vsel %vm884_vm3, %v875_v24, %v891_v35  ;;  %v895_v46 = vsel %vm885_vm1, %v881_v25, 1326507024  ;;  %v535_v38 = vsel %vm533_vm13, %v2822_v13, %v3562_v47  ;;  %v813_v61 = vsub.s32 0, %v2911_v37 }
  0xc7   :  { %v893_v21 = vsel %vm883_vm5, %v890_v55, %v892_v49  ;;  %v896_v33 = vsel %vm884_vm3, %v878_v52, %v895_v46  ;;  %vm635_vm8 = vcmp.lt.s32.totalorder %v2841_v45, 2  ;;  %v956_v57 = vand.u32 2139095040, %v2348_v28 }
  0xc8   :  { %v897_v24 = vsel %vm883_vm5, %v894_v20, %v896_v33  ;;  %v2941_v39 = vmul.u32.u64.low %v898_v14, %v893_v21  ;;  %v2942_v25 = vmul.u32.u64.high %v898_v14, %v893_v21, %v2941_v39  ;;  %v3563_v35 = vxor.u32 2147483648, %v2917_v27 }
  0xc9   :  { %v731_v7 = vsel %vm646_vm11, %v730_v12, %v2757_v30  ;;  %v2110_v55 = vmin.u32 %v813_v61, %v2911_v37  ;;  %v889_v52 = vsel %vm883_vm5, %v886_v4, %v888_v44  ;;  %v3564_v49 = vxor.u32 2147483648, %v2926_v8 }
  0xca   :  { %v2953_v46 = vmul.u32.u64.low %v898_v14, %v897_v24  ;;  %v2954_v20 = vmul.u32.u64.high %v898_v14, %v897_v24, %v2953_v46  ;;  %v957_v21 = vshrl.u32 %v956_v57, 23  ;;  %v2959_v33 = vsel %vm427_vm15, nan, %v2852_v17 }
  0xcb   :  { %v2963_v47 = vsel %vm532_vm0, %v535_v38, %v538_v50  ;;  %v3611_v30 = vand.u32 2147483647, %v2341_v16  ;;  %v815_v12 = vclz %v2110_v55  ;;  %v833_v4 = vsub.s32 4, %v2885_v40 }
  0xcc   :  { %v2974_v44 = vsel %vm2856_vm9, 0, %v731_v7  ;;  %v905_v61 = vmul.u32 %v898_v14, %v889_v52  ;;  %v908_v17 = vadd.s32 1, %v2942_v25  ;;  %v2117_v24 = vadd.s32 4294967169, %v957_v21 }
  0xcd   :  { %vm2967_vm6 = vcmp.le.f32.partialorder %v3611_v30, 0.7853982  ;;  %v641_v26 = vsel %vm639_vm2, %v3563_v35, %v2926_v8  ;;  %v2983_v50 = vand.u32 3, %v2974_v44  ;;  %v803_v38 = vadd.s32 %v2831_v5, %v2846_v34 }
  0xce   :  { %v2111_v57 = vadd.s32 4294967294, %v815_v12  ;;  %v638_v32 = vsel %vm636_vm4, %v2917_v27, %v3564_v49  ;;  %vm907_vm10 = vc.u32 %v2954_v20, %v2941_v39  ;;  %v960_v7 = vand.u32 8388607, %v3565_v11 }
  0xcf   :  { %v963_v14 = vadd.s32 1, %v2117_v24  ;;  %v834_v55 = vsel %vm749_vm7, %v833_v4, %v2885_v40  ;;  %v909_v5 = vsel %vm907_vm10, %v908_v17, %v2942_v25  ;;  %v3570_v34 = vand.u32 2147483647, %v2350_v60 }
  0xd0   :  { %vm2112_vm11 = vcmp.lt.s32.totalorder %v2111_v57, 0  ;;  %v910_v46 = vadd.s32 %v909_v5, %v905_v61  ;;  %v1059_v21 = vand.u32 2139095040, %v2350_v60  ;;  %vm739_vm12 = vcmp.eq.s32.totalorder %v2983_v50, 0 }
  0xd1   :  { %v818_v52 = vsel %vm2112_vm11, 0, %v2111_v57  ;;  %vm964_vm9 = vcmp.gt.s32.totalorder %v963_v14, 0  ;;  %v3002_v24 = vpop.eup %2239  ;;  %v961_v40 = vor.u32 8388608, %v960_v7  ;;  %v3009_v61 = vsel %vm635_vm8, %v638_v32, %v641_v26 }
  0xd2   :  { %v819_v30 = vsub.s32 32, %v818_v52  ;;  %v820_v12 = vshll.u32 %v2911_v37, %v818_v52  ;;  %v823_v35 = vsub.s32 4294967266, %v818_v52  ;;  %v965_v49 = vsel %vm964_vm9, %v963_v14, 0  ;;  %3614 = vst [vmem:[#allocation10_spill] sm:$0xff] %v3002_v24  ;;  %v3005_v25 = vpop.eup %2241 }
  0xd3   :  { %v911_v11 = vadd.s32 536870912, %v910_v46  ;;  %v967_v4 = vand.u32 31, %v965_v49  ;;  %3615 = vst [vmem:[#allocation11_spill] sm:$0xff] %v3005_v25  ;;  %vm742_vm13 = vcmp.eq.s32.totalorder %v2983_v50, 2  ;;  %v3014_v37 = vsel %vm2967_vm6, 0, %v834_v55 }
  0xd4   :  { %v821_v17 = vshrl.u32 %v803_v38, %v819_v30  ;;  %v824_v57 = vadd.s32 127, %v823_v35  ;;  %v3020_v7 = vand.u32 8388607, %v3570_v34  ;;  %v3023_v45 = vadd.s32 %v2941_v39, %v2954_v20 }
  0xd5   :  { %v3016_v14 = vshrl.u32 %v911_v11, 30  ;;  %v968_v5 = vsub.s32 32, %v967_v4  ;;  %v1060_v26 = vshrl.u32 %v1059_v21, 23  ;;  %v3028_v55 = vshll.u32 %v961_v40, 8 }
  0xd6   :  { %v822_v52 = vor.u32 %v821_v17, %v820_v12  ;;  %v825_v10 = vshll.u32 %v824_v57, 23  ;;  %v970_v1 = vshll.u32 %v3583_v54, %v967_v4  ;;  %v973_v34 = vshll.u32 %v3571_v56, %v967_v4 }
  0xd7   :  { %v913_v32 = vshll.u32 %v3016_v14, 30  ;;  %v971_v39 = vshrl.u32 %v3571_v56, %v968_v5  ;;  %v974_v20 = vshrl.u32 %v3573_v63, %v968_v5  ;;  %v976_v21 = vshll.u32 %v3573_v63, %v967_v4 }
  0xd8   :  { %v826_v11 = vor.u32 4788187, %v825_v10  ;;  %v829_v30 = vcvt.s32.f32 %v822_v52  ;;  %v966_v57 = vshrl.u32 %v965_v49, 5  ;;  %v3616_v35 = vmov 2102212464  }
  0xd9   :  { %v3032_v12 = vsub.s32 %v910_v46, %v913_v32  ;;  %v977_v38 = vshrl.u32 %v3616_v35, %v968_v5  ;;  %v2121_v40 = vadd.s32 4294967169, %v1060_v26  ;;  %v3617_v10 = vxor.u32 2147483648, %v3005_v25 }
  0xda   :  { %v827_v17 = vand.u32 2147483647, %v826_v11  ;;  %v3618_v46 = vxor.u32 2147483648, %v3002_v24  ;;  %v979_v11 = vshll.u32 %v3616_v35, %v967_v4  ;;  %v969_v63 = vshrl.u32 %v3583_v54, %v968_v5 }
  0xdb   :  { %v741_v52 = vsel %vm739_vm12, %v3002_v24, %v3617_v10  ;;  %v916_v56 = vsub.s32 0, %v3032_v12  ;;  %v3619_v26 = vmov 920167782   ;;  %vm530_vm14 = vweird.f32 %v2328_v9 }
  0xdc   :  { %v744_v32 = vsel %vm742_vm13, %v3618_v46, %v3005_v25  ;;  %v830_v49 = vmul.f32 %v829_v30, %v827_v17  ;;  %v980_v3 = vshrl.u32 %v3619_v26, %v968_v5  ;;  %v982_v15 = vshll.u32 %v3619_v26, %v967_v4 }
  0xdd   :  { %vm633_vm0 = vweird.f32 %v2337_v51  ;;  %vm738_vm1 = vcmp.lt.s32.totalorder %v2983_v50, 2  ;;  %v2114_v10 = vmin.u32 %v916_v56, %v3032_v12  ;;  %v972_v46 = vor.u32 %v971_v39, %v970_v1 }
  0xde   :  { %v975_v0 = vor.u32 %v974_v20, %v973_v34  ;;  %v978_v41 = vor.u32 %v977_v38, %v976_v21  ;;  %v831_v24 = vxor.u32 2147483648, %v830_v49  ;;  %v981_v25 = vor.u32 %v980_v3, %v979_v11 }
  0xdf   :  { %v983_v30 = vshrl.u32 %v3609_v19, %v968_v5  ;;  %vm985_vm2 = vcmp.lt.s32.totalorder %v966_v57, 1  ;;  %v918_v17 = vclz %v2114_v10  ;;  %vm986_vm3 = vcmp.lt.s32.totalorder %v966_v57, 2 }
  0xe0   :  { %vm987_vm4 = vcmp.lt.s32.totalorder %v966_v57, 3  ;;  %vm988_vm5 = vcmp.lt.s32.totalorder %v966_v57, 4  ;;  %v832_v4 = vsel %vm749_vm7, %v831_v24, %v830_v49  ;;  %v989_v27 = vsel %vm985_vm2, %v969_v63, %v972_v46 }
  0xe1   :  { %v984_v54 = vor.u32 %v983_v30, %v982_v15  ;;  %v990_v56 = vsel %vm988_vm5, %v978_v41, 2102212464  ;;  %vm3588_vm8 = vweird.f32 %v2339_v53  ;;  %v835_v1 = vsel %vm2967_vm6, %v2341_v16, %v832_v4 }
  0xe2   :  { %vm852_vm10 = vcmp.lt.s32.totalorder %v2346_v59, 0  ;;  %v2115_v3 = vadd.s32 4294967294, %v918_v17  ;;  %v991_v34 = vsel %vm987_vm4, %v975_v0, %v990_v56  ;;  %v993_v5 = vsel %vm985_vm2, %v972_v46, %v975_v0 }
  0xe3   :  { %2243 = vcosq.f32 %v835_v1  ;;  %v936_v15 = vsub.s32 4, %v3016_v14  ;;  %v994_v63 = vsel %vm988_vm5, %v981_v25, 920167782  ;;  %v997_v24 = vsel %vm985_vm2, %v975_v0, %v978_v41 }
  0xe4   :  { %2245 = vsinq.f32 %v835_v1  ;;  %vm2116_vm7 = vcmp.lt.s32.totalorder %v2115_v3, 0  ;;  %v995_v38 = vsel %vm987_vm4, %v978_v41, %v994_v63  ;;  %v998_v43 = vsel %vm988_vm5, %v984_v54, 1326507024 }
  0xe5   :  { %v3620_v39 = vand.u32 2147483647, %v2346_v59  ;;  %v921_v21 = vsel %vm2116_vm7, 0, %v2115_v3  ;;  %v992_v11 = vsel %vm986_vm3, %v989_v27, %v991_v34  ;;  %v996_v49 = vsel %vm986_vm3, %v993_v5, %v995_v38 }
  0xe6   :  { %v999_v10 = vsel %vm987_vm4, %v981_v25, %v998_v43  ;;  %v922_v0 = vsub.s32 32, %v921_v21  ;;  %v923_v46 = vshll.u32 %v3032_v12, %v921_v21  ;;  %v926_v30 = vsub.s32 4294967266, %v921_v21 }
  0xe7   :  { %vm3076_vm6 = vcmp.le.f32.partialorder %v3620_v39, 0.7853982  ;;  %v1000_v41 = vsel %vm986_vm3, %v997_v24, %v999_v10  ;;  %v3090_v4 = vmul.u32.u64.low %v3028_v55, %v996_v49  ;;  %v3091_v56 = vmul.u32.u64.high %v3028_v55, %v996_v49, %v3090_v4 }
  0xe8   :  { %v3086_v54 = vmul.u32.u64.low %v3028_v55, %v1000_v41  ;;  %v3087_v17 = vmul.u32.u64.high %v3028_v55, %v1000_v41, %v3086_v54  ;;  %v3095_v27 = vand.u32 3, %v3014_v37  ;;  %v924_v25 = vshrl.u32 %v3023_v45, %v922_v0 }
  0xe9   :  { %v927_v1 = vadd.s32 127, %v926_v30  ;;  %v1066_v3 = vadd.s32 1, %v2121_v40  ;;  %v540_v12 = vsel %vm530_vm14, nan, %v2963_v47  ;;  %v3104_v57 = vsel %vm633_vm0, nan, %v3009_v61 }
  0xea   :  { %v745_v34 = vsel %vm738_vm1, %v741_v52, %v744_v32  ;;  %v1064_v5 = vor.u32 8388608, %v3020_v7  ;;  %v925_v63 = vor.u32 %v924_v25, %v923_v46  ;;  %v1008_v45 = vmul.u32 %v3028_v55, %v992_v11 }
  0xeb   :  { %v928_v24 = vshll.u32 %v927_v1, 23  ;;  %vm1067_vm11 = vcmp.gt.s32.totalorder %v1066_v3, 0  ;;  %v937_v40 = vsel %vm852_vm10, %v936_v15, %v3016_v14  ;;  %vm1010_vm9 = vc.u32 %v3087_v17, %v3090_v4 }
  0xec   :  { %v1011_v47 = vadd.s32 1, %v3091_v56  ;;  %v1068_v61 = vsel %vm1067_vm11, %v1066_v3, 0  ;;  %vm842_vm12 = vcmp.eq.s32.totalorder %v3095_v27, 0  ;;  %v932_v52 = vcvt.s32.f32 %v925_v63 }
  0xed   :  { %v929_v50 = vor.u32 4788187, %v928_v24  ;;  %v1070_v7 = vand.u32 31, %v1068_v61  ;;  %v3119_v32 = vsel %vm3588_vm8, nan, %v745_v34  ;;  %vm845_vm13 = vcmp.eq.s32.totalorder %v3095_v27, 2 }
  0xee   :  { %v1012_v55 = vsel %vm1010_vm9, %v1011_v47, %v3091_v56  ;;  %v3125_v14 = vmul.f32 %v2959_v33, %v2569_v58  ;;  %v3129_v38 = vsel %vm3076_vm6, 0, %v937_v40  ;;  %v3134_v11 = vshll.u32 %v1064_v5, 8 }
  0xef   :  { %v930_v15 = vand.u32 2147483647, %v929_v50  ;;  %v1013_v43 = vadd.s32 %v1012_v55, %v1008_v45  ;;  %v1071_v39 = vsub.s32 32, %v1070_v7  ;;  %v3132_v21 = vand.u32 3, %v3129_v38 }
  0xf0   :  { %v3137_v49 = vmul.f32 %v540_v12, %v2579_v22  ;;  %v1260_v10 = vadd.s32 3, %v2680_v6  ;;  %v3140_v0 = vpop.eup %2243  ;;  %v3623_v30 = vmov 683565275   ;;  %v3624_v54 = vmov 2475754826  }
  0xf1   :  { %v933_v33 = vmul.f32 %v932_v52, %v930_v15  ;;  %v1014_v46 = vadd.s32 536870912, %v1013_v43  ;;  %v1073_v41 = vshll.u32 %v3623_v30, %v1070_v7  ;;  %v1074_v56 = vshrl.u32 %v3624_v54, %v1071_v39  ;;  %v3144_v25 = vpop.eup %2245 }
  0xf2   :  { %vm841_vm1 = vcmp.lt.s32.totalorder %v3095_v27, 2  ;;  %v1076_v1 = vshll.u32 %v3624_v54, %v1070_v7  ;;  %v3625_v3 = vmov 2131351028   ;;  %v1082_v12 = vshll.u32 %v3616_v35, %v1070_v7 }
  0xf3   :  { %v1077_v34 = vshrl.u32 %v3625_v3, %v1071_v39  ;;  %v1083_v6 = vshrl.u32 %v3619_v26, %v1071_v39  ;;  %v934_v63 = vxor.u32 2147483648, %v933_v33  ;;  %v1015_v24 = vshrl.u32 %v1014_v46, 30 }
  0xf4   :  { %v1069_v45 = vshrl.u32 %v1068_v61, 5  ;;  %v843_v40 = vxor.u32 2147483648, %v3144_v25  ;;  %v1079_v47 = vshll.u32 %v3625_v3, %v1070_v7  ;;  %v1080_v50 = vshrl.u32 %v3616_v35, %v1071_v39 }
  0xf5   :  { %v1085_v52 = vshll.u32 %v3619_v26, %v1070_v7  ;;  %v935_v55 = vsel %vm852_vm10, %v934_v63, %v933_v33  ;;  %vm955_vm2 = vcmp.lt.s32.totalorder %v2348_v28, 0  ;;  %v1016_v15 = vshll.u32 %v1015_v24, 30 }
  0xf6   :  { %v1072_v54 = vshrl.u32 %v3623_v30, %v1071_v39  ;;  %v1075_v5 = vor.u32 %v1074_v56, %v1073_v41  ;;  %vm3587_vm3 = vweird.f32 %v2341_v16  ;;  %v938_v61 = vsel %vm3076_vm6, %v2346_v59, %v935_v55 }
  0xf7   :  { %v1078_v46 = vor.u32 %v1077_v34, %v1076_v1  ;;  %v1084_v3 = vor.u32 %v1083_v6, %v1082_v12  ;;  %v1086_v35 = vshrl.u32 %v3609_v19, %v1071_v39  ;;  %v3626_v26 = vxor.u32 2147483648, %v3140_v0 }
  0xf8   :  { %2247 = vcosq.f32 %v938_v61  ;;  %v3170_v33 = vsub.s32 %v1013_v43, %v1016_v15  ;;  %vm1088_vm4 = vcmp.lt.s32.totalorder %v1069_v45, 1  ;;  %v844_v20 = vsel %vm842_vm12, %v3140_v0, %v843_v40 }
  0xf9   :  { %v847_v7 = vsel %vm845_vm13, %v3626_v26, %v3144_v25  ;;  %2249 = vsinq.f32 %v938_v61  ;;  %v3627_v30 = vand.u32 2147483647, %v2348_v28  ;;  %v1081_v39 = vor.u32 %v1080_v50, %v1079_v47 }
  0xfa   :  { %v1087_v41 = vor.u32 %v1086_v35, %v1085_v52  ;;  %v1019_v56 = vsub.s32 0, %v3170_v33  ;;  %v1039_v43 = vsub.s32 4, %v1015_v24  ;;  %vm1090_vm10 = vcmp.lt.s32.totalorder %v1069_v45, 3 }
  0xfb   :  { %vm3179_vm5 = vcmp.le.f32.partialorder %v3627_v30, 0.7853982  ;;  %vm1091_vm7 = vcmp.lt.s32.totalorder %v1069_v45, 4  ;;  %vm1089_vm6 = vcmp.lt.s32.totalorder %v1069_v45, 2  ;;  %v1096_v34 = vsel %vm1088_vm4, %v1075_v5, %v1078_v46 }
  0xfc   :  { %v1093_v1 = vsel %vm1091_vm7, %v1081_v39, 2102212464  ;;  %v1097_v12 = vsel %vm1091_vm7, %v1084_v3, 920167782  ;;  %v2118_v6 = vmin.u32 %v1019_v56, %v3170_v33  ;;  %v1092_v63 = vsel %vm1088_vm4, %v1072_v54, %v1075_v5 }
  0xfd   :  { %v3187_v55 = vand.u32 3, %v1260_v10  ;;  %v1364_v15 = vadd.s32 3, %v2764_v23  ;;  %v1094_v47 = vsel %vm1090_vm10, %v1078_v46, %v1093_v1  ;;  %v1098_v50 = vsel %vm1090_vm10, %v1081_v39, %v1097_v12 }
  0xfe   :  { %v1100_v52 = vsel %vm1088_vm4, %v1078_v46, %v1081_v39  ;;  %v1101_v61 = vsel %vm1091_vm7, %v1087_v41, 1326507024  ;;  %v848_v35 = vsel %vm841_vm1, %v844_v20, %v847_v7  ;;  %v1021_v26 = vclz %v2118_v6 }
  0xff   :  { %v1099_v30 = vsel %vm1089_vm6, %v1096_v34, %v1098_v50  ;;  %v1102_v56 = vsel %vm1090_vm10, %v1084_v3, %v1101_v61  ;;  %vm945_vm11 = vcmp.eq.s32.totalorder %v3132_v21, 0  ;;  %vm948_vm9 = vcmp.eq.s32.totalorder %v3132_v21, 2 }
 0x100   :  { %v1040_v23 = vsel %vm955_vm2, %v1039_v43, %v1015_v24  ;;  %v1103_v10 = vsel %vm1089_vm6, %v1100_v52, %v1102_v56  ;;  %v3203_v5 = vmul.u32.u64.low %v3134_v11, %v1099_v30  ;;  %v3204_v54 = vmul.u32.u64.high %v3134_v11, %v1099_v30, %v3203_v5 }
 0x101   :  { %v2119_v27 = vadd.s32 4294967294, %v1021_v26  ;;  %v1095_v46 = vsel %vm1089_vm6, %v1092_v63, %v1094_v47  ;;  %v3208_v7 = vmul.u32.u64.low %v3134_v11, %v1103_v10  ;;  %v3209_v20 = vmul.u32.u64.high %v3134_v11, %v1103_v10, %v3208_v7 }
 0x102   :  { %v1009_v3 = vadd.s32 %v3090_v4, %v3087_v17  ;;  %v3215_v39 = vmul.f32 %v3104_v57, %v2644_v29  ;;  %v3219_v24 = vmul.f32 %v3119_v32, %v2663_v42  ;;  %v1365_v41 = vand.u32 3, %v1364_v15 }
 0x103   :  { %v849_v45 = vsel %vm3587_vm3, nan, %v848_v35  ;;  %vm944_vm12 = vcmp.lt.s32.totalorder %v3132_v21, 2  ;;  %vm2120_vm13 = vcmp.lt.s32.totalorder %v2119_v27, 0  ;;  %v3226_v43 = vsel %vm3179_vm5, 0, %v1040_v23 }
 0x104   :  { %v1468_v17 = vadd.s32 3, %v2785_v62  ;;  %v1024_v4 = vsel %vm2120_vm13, 0, %v2119_v27  ;;  %v3230_v57 = vand.u32 3, %v3226_v43  ;;  %v1111_v32 = vmul.u32 %v3134_v11, %v1095_v46 }
 0x105   :  { %v1114_v1 = vadd.s32 1, %v3204_v54  ;;  %v1025_v34 = vsub.s32 32, %v1024_v4  ;;  %v1026_v12 = vshll.u32 %v3170_v33, %v1024_v4  ;;  %v1029_v6 = vsub.s32 4294967266, %v1024_v4  ;;  %v3236_v63 = vpop.eup %2247 }
 0x106   :  { %vm1263_vm1 = vcmp.eq.s32.totalorder %v3187_v55, 0  ;;  %vm942_vm4 = vweird.f32 %v2346_v59  ;;  %vm1113_vm10 = vc.u32 %v3209_v20, %v3203_v5  ;;  %vm1266_vm7 = vcmp.eq.s32.totalorder %v3187_v55, 2  ;;  %v3241_v62 = vpop.eup %2249 }
 0x107   :  { %vm1367_vm6 = vcmp.eq.s32.totalorder %v1365_v41, 0  ;;  %vm1370_vm13 = vcmp.eq.s32.totalorder %v1365_v41, 2  ;;  %v949_v11 = vxor.u32 2147483648, %v3236_v63  ;;  %v1027_v15 = vshrl.u32 %v1009_v3, %v1025_v34 }
 0x108   :  { %v1030_v47 = vadd.s32 127, %v1029_v6  ;;  %v1115_v33 = vsel %vm1113_vm10, %v1114_v1, %v3204_v54  ;;  %v946_v50 = vxor.u32 2147483648, %v3241_v62  ;;  %vm1262_vm3 = vcmp.lt.s32.totalorder %v3187_v55, 2 }
 0x109   :  { %v1116_v52 = vadd.s32 %v1115_v33, %v1111_v32  ;;  %v3630_v61 = vxor.u32 2147483648, %v2722_v2  ;;  %v1028_v26 = vor.u32 %v1027_v15, %v1026_v12  ;;  %v3631_v56 = vxor.u32 2147483648, %v2718_v48 }
 0x10a   :  { %v1031_v30 = vshll.u32 %v1030_v47, 23  ;;  %v1469_v10 = vand.u32 3, %v1468_v17  ;;  %vm1366_vm8 = vcmp.lt.s32.totalorder %v1365_v41, 2  ;;  %v3632_v54 = vxor.u32 2147483648, %v2837_v18 }
 0x10b   :  { %v1265_v35 = vsel %vm1263_vm1, %v2718_v48, %v3630_v61  ;;  %v1268_v23 = vsel %vm1266_vm7, %v3631_v56, %v2722_v2  ;;  %v1117_v27 = vadd.s32 536870912, %v1116_v52  ;;  %v3633_v7 = vxor.u32 2147483648, %v2822_v13 }
 0x10c   :  { %v1369_v46 = vsel %vm1367_vm6, %v2822_v13, %v3632_v54  ;;  %v947_v48 = vsel %vm945_vm11, %v3236_v63, %v946_v50  ;;  %v950_v2 = vsel %vm948_vm9, %v949_v11, %v3241_v62  ;;  %v1032_v17 = vor.u32 4788187, %v1031_v30 }
 0x10d   :  { %v1372_v3 = vsel %vm1370_vm13, %v3633_v7, %v2837_v18  ;;  %v1035_v4 = vcvt.s32.f32 %v1028_v26  ;;  %v1118_v32 = vshrl.u32 %v1117_v27, 30  ;;  %v3272_v1 = vmul.f32 %v849_v45, %v2704_v31 }
 0x10e   :  { %v1269_v13 = vsel %vm1262_vm3, %v1265_v35, %v1268_v23  ;;  %v1572_v18 = vadd.s32 3, %v2974_v44  ;;  %v1033_v41 = vand.u32 2147483647, %v1032_v17  ;;  %v1373_v34 = vsel %vm1366_vm8, %v1369_v46, %v1372_v3  ;;  %v3635_v35 = vld [vmem:[#allocation9_spill] sm:$0xff]  ;;  %v3640_v3 = vld [vmem:[#allocation11_spill] sm:$0xff] }
 0x10f   :  { %vm1471_vm11 = vcmp.eq.s32.totalorder %v1469_v10, 0  ;;  %v1676_v12 = vadd.s32 3, %v3014_v37  ;;  %v951_v6 = vsel %vm944_vm12, %v947_v48, %v950_v2  ;;  %vm1058_vm9 = vcmp.lt.s32.totalorder %v2350_v60, 0  ;;  %v3642_v2 = vld [vmem:[#allocation10_spill] sm:$0xff] }
 0x110   :  { %v3282_v15 = vadd.s32 %v3203_v5, %v3209_v20  ;;  %v1119_v45 = vshll.u32 %v1118_v32, 30  ;;  %v1573_v47 = vand.u32 3, %v1572_v18  ;;  %v1036_v33 = vmul.f32 %v1035_v4, %v1033_v41 }
 0x111   :  { %v1270_v55 = vsel %vm427_vm15, nan, %v1269_v13  ;;  %vm1474_vm3 = vcmp.eq.s32.totalorder %v1469_v10, 2  ;;  %v1677_v44 = vand.u32 3, %v1676_v12  ;;  %v1374_v37 = vsel %vm530_vm14, nan, %v1373_v34 }
 0x112   :  { %v3286_v61 = vsub.s32 %v1116_v52, %v1119_v45  ;;  %vm1470_vm8 = vcmp.lt.s32.totalorder %v1469_v10, 2  ;;  %v3634_v21 = vxor.u32 2147483648, %v2926_v8  ;;  %v952_v5 = vsel %vm942_vm4, nan, %v951_v6  ;;  %v3645_v6 = vld [vmem:[#allocation7_spill] sm:$0xff] }
 0x113   :  { %v1037_v20 = vxor.u32 2147483648, %v1036_v33  ;;  %v3636_v30 = vand.u32 2147483647, %v2350_v60  ;;  %vm1575_vm15 = vcmp.eq.s32.totalorder %v1573_v47, 0  ;;  %vm1578_vm1 = vcmp.eq.s32.totalorder %v1573_v47, 2 }
 0x114   :  { %v1473_v26 = vsel %vm1471_vm11, %v3635_v35, %v3634_v21  ;;  %v1122_v9 = vsub.s32 0, %v3286_v61  ;;  %v1142_v52 = vsub.s32 4, %v1118_v32  ;;  %v3639_v56 = vxor.u32 2147483648, %v3635_v35 }
 0x115   :  { %vm3297_vm12 = vcmp.le.f32.partialorder %v3636_v30, 0.7853982  ;;  %v1780_v27 = vadd.s32 3, %v3129_v38  ;;  %v1038_v54 = vsel %vm955_vm2, %v1037_v20, %v1036_v33  ;;  %vm1574_vm14 = vcmp.lt.s32.totalorder %v1573_v47, 2 }
 0x116   :  { %v1476_v23 = vsel %vm1474_vm3, %v3639_v56, %v2926_v8  ;;  %vm1679_vm10 = vcmp.eq.s32.totalorder %v1677_v44, 0  ;;  %vm1682_vm7 = vcmp.eq.s32.totalorder %v1677_v44, 2  ;;  %v1041_v46 = vsel %vm3179_vm5, %v2348_v28, %v1038_v54 }
 0x117   :  { %v2122_v7 = vmin.u32 %v1122_v9, %v3286_v61  ;;  %v3641_v48 = vxor.u32 2147483648, %v3640_v3  ;;  %v3643_v8 = vxor.u32 2147483648, %v3642_v2  ;;  %2251 = vcosq.f32 %v1041_v46 }
 0x118   :  { %v1477_v4 = vsel %vm1470_vm8, %v1473_v26, %v1476_v23  ;;  %vm1678_vm2 = vcmp.lt.s32.totalorder %v1677_v44, 2  ;;  %v1681_v13 = vsel %vm1679_vm10, %v3140_v0, %v843_v40  ;;  %2253 = vsinq.f32 %v1041_v46  ;;  %v2009_v46 = vld [vmem:[%s3552_s3 + $0x10] sm:$0xff] }
 0x119   :  { %v1577_v17 = vsel %vm1575_vm15, %v3642_v2, %v3641_v48  ;;  %v1580_v38 = vsel %vm1578_vm1, %v3643_v8, %v3640_v3  ;;  %v1124_v19 = vclz %v2122_v7  ;;  %v3644_v18 = vxor.u32 2147483648, %v3140_v0 }
 0x11a   :  { %v1781_v34 = vand.u32 3, %v1780_v27  ;;  %v1143_v12 = vsel %vm1058_vm9, %v1142_v52, %v1118_v32  ;;  %v1164_v45 = vmul.f32 %v952_v5, %v3645_v6  ;;  %v1581_v10 = vsel %vm1574_vm14, %v1577_v17, %v1580_v38 }
 0x11b   :  { %v1684_v41 = vsel %vm1682_vm7, %v3644_v18, %v3144_v25  ;;  %v1884_v33 = vadd.s32 3, %v3226_v43  ;;  %v2123_v44 = vadd.s32 4294967294, %v1124_v19  ;;  %v1478_v40 = vsel %vm633_vm0, nan, %v1477_v4  ;;  %v2011_v4 = vld [vmem:[%s3552_s3 + $0x20] sm:$0xff] }
 0x11c   :  { %v1685_v21 = vsel %vm1678_vm2, %v1681_v13, %v1684_v41  ;;  %vm1782_vm5 = vcmp.lt.s32.totalorder %v1781_v34, 2  ;;  %vm1783_vm6 = vcmp.eq.s32.totalorder %v1781_v34, 0  ;;  %vm1786_vm13 = vcmp.eq.s32.totalorder %v1781_v34, 2  ;;  %v2012_v13 = vld [vmem:[%s3552_s3 + $0x28] sm:$0xff] }
 0x11d   :  { %v1785_v0 = vsel %vm1783_vm6, %v3236_v63, %v946_v50  ;;  %v3335_v25 = vand.u32 3, %v1884_v33  ;;  %vm1051_vm11 = vcmp.eq.s32.totalorder %v3230_v57, 2  ;;  %vm2124_vm3 = vcmp.lt.s32.totalorder %v2123_v44, 0 }
 0x11e   :  { %v3340_v43 = vsel %vm3297_vm12, 0, %v1143_v12  ;;  %vm3646_vm8 = vweird.f32 %v2339_v53  ;;  %v1788_v51 = vsel %vm1786_vm13, %v949_v11, %v3241_v62  ;;  %vm1048_vm0 = vcmp.eq.s32.totalorder %v3230_v57, 0 }
 0x11f   :  { %v1582_v32 = vsel %vm3646_vm8, nan, %v1581_v10  ;;  %v1127_v50 = vsel %vm2124_vm3, 0, %v2123_v44  ;;  %vm3647_vm15 = vweird.f32 %v2341_v16  ;;  %v1789_v35 = vsel %vm1782_vm5, %v1785_v0, %v1788_v51 }
 0x120   :  { %v1686_v47 = vsel %vm3647_vm15, nan, %v1685_v21  ;;  %v3351_v26 = vmul.f32 %v1270_v55, %v2569_v58  ;;  %vm1047_vm1 = vcmp.lt.s32.totalorder %v3230_v57, 2  ;;  %v1128_v5 = vsub.s32 32, %v1127_v50 }
 0x121   :  { %v1129_v53 = vshll.u32 %v3286_v61, %v1127_v50  ;;  %v1132_v20 = vsub.s32 4294967266, %v1127_v50  ;;  %v1790_v63 = vsel %vm942_vm4, nan, %v1789_v35  ;;  %vm1045_vm14 = vweird.f32 %v2348_v28 }
 0x122   :  { %vm1886_vm10 = vcmp.lt.s32.totalorder %v3335_v25, 2  ;;  %vm1887_vm7 = vcmp.eq.s32.totalorder %v3335_v25, 0  ;;  %v3361_v16 = vmul.f32 %v1374_v37, %v2579_v22  ;;  %v3364_v58 = vmul.f32 %v1478_v40, %v2644_v29 }
 0x123   :  { %v1130_v62 = vshrl.u32 %v3282_v15, %v1128_v5  ;;  %v1133_v11 = vadd.s32 127, %v1132_v20  ;;  %vm1890_vm2 = vcmp.eq.s32.totalorder %v3335_v25, 2  ;;  %v2002_v59 = vmul.f32 %v1582_v32, %v2663_v42  ;;  %v2013_v20 = vld [vmem:[%s3552_s3 + $0x30] sm:$0xff] }
 0x124   :  { %v2003_v55 = vmul.f32 %v1686_v47, %v2704_v31  ;;  %v2004_v61 = vmul.f32 %v1790_v63, %v3645_v6  ;;  %v3374_v30 = vstv %s3550_s1  ;;  %v3379_v22 = vstv %s3551_s2  ;;  %v2007_v31 = vld [vmem:[%s3552_s3] sm:$0xff]  ;;  %v2252_v27 = vpop.eup %2251  ;;  %v3648_v47 = vld [vmem:[#allocation8_spill] sm:$0xff] }
 0x125   :  { %v1131_v29 = vor.u32 %v1130_v62, %v1129_v53  ;;  %v1134_v15 = vshll.u32 %v1133_v11, 23  ;;  %v2024_v37 = vmul.f32 %v3374_v30, %v3125_v14  ;;  %v2025_v42 = vmul.f32 %v3374_v30, %v3137_v49  ;;  %v2008_v49 = vld [vmem:[%s3552_s3 + $0x8] sm:$0xff]  ;;  %v2254_v7 = vpop.eup %2253 }
 0x126   :  { %v2026_v9 = vmul.f32 %v3374_v30, %v3215_v39  ;;  %v2027_v52 = vmul.f32 %v3374_v30, %v3219_v24  ;;  %v2028_v56 = vmul.f32 %v3374_v30, %v3272_v1  ;;  %v2029_v23 = vmul.f32 %v3374_v30, %v1164_v45  ;;  %v2010_v1 = vld [vmem:[%s3552_s3 + $0x18] sm:$0xff] }
 0x127   :  { %v1135_v14 = vor.u32 4788187, %v1134_v15  ;;  %v1138_v54 = vcvt.s32.f32 %v1131_v29  ;;  %v2033_v39 = vadd.f32 %v3379_v22, %v2024_v37  ;;  %v2034_v24 = vadd.f32 %v3379_v22, %v2025_v42  ;;  %v2016_v29 = vld [vmem:[%s3552_s3 + $0x48] sm:$0xff]  ;;  %v2019_v37 = vld [vmem:[%s3552_s3 + $0x60] sm:$0xff] }
 0x128   :  { %v1052_v3 = vxor.u32 2147483648, %v2252_v27  ;;  %v2035_v48 = vadd.f32 %v3379_v22, %v2026_v9  ;;  %v2036_v2 = vadd.f32 %v3379_v22, %v2027_v52  ;;  %v2037_v17 = vadd.f32 %v3379_v22, %v2028_v56  ;;  %v2020_v42 = vld [vmem:[%s3552_s3 + $0x68] sm:$0xff]  ;;  %v2021_v56 = vld [vmem:[%s3552_s3 + $0x70] sm:$0xff] }
 0x129   :  { %v1049_v8 = vxor.u32 2147483648, %v2254_v7  ;;  %v1136_v38 = vand.u32 2147483647, %v1135_v14  ;;  %v2038_v19 = vadd.f32 %v3379_v22, %v2029_v23  ;;  %v2041_v18 = vadd.f32 %v2033_v39, %v2007_v31 }
 0x12a   :  { %v1053_v41 = vsel %vm1051_vm11, %v1052_v3, %v2254_v7  ;;  %v1892_v34 = vsel %vm1890_vm2, %v1052_v3, %v2254_v7  ;;  %v2042_v12 = vadd.f32 %v2034_v24, %v2008_v49  ;;  %v2043_v6 = vadd.f32 %v2035_v48, %v2009_v46 }
 0x12b   :  { %v1050_v45 = vsel %vm1048_vm0, %v2252_v27, %v1049_v8  ;;  %v1139_v10 = vmul.f32 %v1138_v54, %v1136_v38  ;;  %v1889_v33 = vsel %vm1887_vm7, %v2252_v27, %v1049_v8  ;;  %v2044_v44 = vadd.f32 %v2036_v2, %v2010_v1  ;;  %2049 = vst [vmem:[%s3553_s4] sm:$0xff] %v2041_v18  ;;  %v3649_v38 = vld [vmem:[#allocation5_spill] sm:$0xff] }
 0x12c   :  { %v1054_v21 = vsel %vm1047_vm1, %v1050_v45, %v1053_v41  ;;  %v1893_v40 = vsel %vm1886_vm10, %v1889_v33, %v1892_v34  ;;  %v2045_v0 = vadd.f32 %v2037_v17, %v2011_v4  ;;  %v2046_v32 = vadd.f32 %v2038_v19, %v2012_v13  ;;  %2050 = vst [vmem:[%s3553_s4 + $0x8] sm:$0xff] %v2042_v12  ;;  %v3650_v4 = vld [vmem:[#allocation6_spill] sm:$0xff] }
 0x12d   :  { %2051 = vst [vmem:[%s3553_s4 + $0x10] sm:$0xff] %v2043_v6  ;;  %v1055_v51 = vsel %vm1045_vm14, nan, %v1054_v21  ;;  %v1140_v50 = vxor.u32 2147483648, %v1139_v10  ;;  %v1894_v57 = vsel %vm1045_vm14, nan, %v1893_v40  ;;  %2052 = vst [vmem:[%s3553_s4 + $0x18] sm:$0xff] %v2044_v44  ;;  %v2057_v25 = vmul.f32 %v3374_v30, %v3351_v26 }
 0x12e   :  { %v1165_v35 = vmul.f32 %v1055_v51, %v3648_v47  ;;  %v2005_v5 = vmul.f32 %v1894_v57, %v3648_v47  ;;  %2053 = vst [vmem:[%s3553_s4 + $0x20] sm:$0xff] %v2045_v0  ;;  %2054 = vst [vmem:[%s3553_s4 + $0x28] sm:$0xff] %v2046_v32  ;;  %v2058_v28 = vmul.f32 %v3374_v30, %v3361_v16  ;;  %v1988_v2 = vadd.s32 3, %v3340_v43  ;;  %v2014_v47 = vld [vmem:[%s3552_s3 + $0x38] sm:$0xff] }
 0x12f   :  { %v2059_v53 = vmul.f32 %v3374_v30, %v3364_v58  ;;  %v1141_v26 = vsel %vm1058_vm9, %v1140_v50, %v1139_v10  ;;  %v2060_v63 = vmul.f32 %v3374_v30, %v2002_v59  ;;  %v2061_v62 = vmul.f32 %v3374_v30, %v2003_v55  ;;  %v2015_v58 = vld [vmem:[%s3552_s3 + $0x40] sm:$0xff]  ;;  %v2017_v59 = vld [vmem:[%s3552_s3 + $0x50] sm:$0xff] }
 0x130   :  { %v2062_v11 = vmul.f32 %v3374_v30, %v2004_v61  ;;  %v1144_v16 = vsel %vm3297_vm12, %v2350_v60, %v1141_v26  ;;  %v2030_v55 = vmul.f32 %v3374_v30, %v1165_v35  ;;  %v2063_v61 = vmul.f32 %v3374_v30, %v2005_v5 }
 0x131   :  { %v2065_v15 = vadd.f32 %v2057_v25, %v3379_v22  ;;  %2255 = vcosq.f32 %v1144_v16  ;;  %v2066_v31 = vadd.f32 %v2058_v28, %v3379_v22  ;;  %v2067_v9 = vadd.f32 %v2059_v53, %v3379_v22 }
 0x132   :  { %v2068_v52 = vadd.f32 %v2060_v63, %v3379_v22  ;;  %2257 = vsinq.f32 %v1144_v16  ;;  %v2039_v23 = vadd.f32 %v3379_v22, %v2030_v55  ;;  %v2069_v27 = vadd.f32 %v2061_v62, %v3379_v22 }
 0x133   :  { %v2070_v14 = vadd.f32 %v2062_v11, %v3379_v22  ;;  %v2071_v54 = vadd.f32 %v2063_v61, %v3379_v22  ;;  %v2073_v49 = vadd.f32 %v2065_v15, %v2015_v58  ;;  %v2074_v46 = vadd.f32 %v2066_v31, %v2016_v29 }
 0x134   :  { %v2075_v39 = vadd.f32 %v2067_v9, %v2017_v59  ;;  %v2047_v24 = vadd.f32 %v2039_v23, %v2013_v20  ;;  %v2076_v7 = vadd.f32 %v2068_v52, %v2018_v36  ;;  %v2077_v3 = vadd.f32 %v2069_v27, %v2019_v37 }
 0x135   :  { %v2078_v1 = vadd.f32 %v2070_v14, %v2020_v42  ;;  %v2079_v48 = vadd.f32 %v2071_v54, %v2021_v56  ;;  %2081 = vst [vmem:[%s3553_s4 + $0x40] sm:$0xff] %v2073_v49  ;;  %2082 = vst [vmem:[%s3553_s4 + $0x48] sm:$0xff] %v2074_v46  ;;  %v1149_v17 = vand.u32 3, %v3340_v43  ;;  %v1989_v8 = vand.u32 3, %v1988_v2 }
 0x136   :  { %2083 = vst [vmem:[%s3553_s4 + $0x50] sm:$0xff] %v2075_v39  ;;  %2055 = vst [vmem:[%s3553_s4 + $0x30] sm:$0xff] %v2047_v24  ;;  %v321_v13 = vmul.f32 %v3650_v4, %v3649_v38  ;;  %vm322_vm4 = vcmp.eq.f32.partialorder %v3649_v38, inf  ;;  %vm324_vm9 = vcmp.eq.f32.partialorder %v3649_v38, 0.0  ;;  %v325_v18 = vand.u32 2147483648, %v3649_v38 }
 0x137   :  { %2084 = vst [vmem:[%s3553_s4 + $0x58] sm:$0xff] %v2076_v7  ;;  %2085 = vst [vmem:[%s3553_s4 + $0x60] sm:$0xff] %v2077_v3  ;;  %vm1154_vm12 = vcmp.eq.s32.totalorder %v1149_v17, 2  ;;  %vm1994_vm5 = vcmp.eq.s32.totalorder %v1989_v8, 2  ;;  %vm1151_vm6 = vcmp.eq.s32.totalorder %v1149_v17, 0  ;;  %vm1991_vm13 = vcmp.eq.s32.totalorder %v1989_v8, 0 }
 0x138   :  { %2086 = vst [vmem:[%s3553_s4 + $0x68] sm:$0xff] %v2078_v1  ;;  %2087 = vst [vmem:[%s3553_s4 + $0x70] sm:$0xff] %v2079_v48  ;;  %v323_v34 = vsel %vm322_vm4, %v3649_v38, %v321_v13  ;;  %vm1150_vm11 = vcmp.lt.s32.totalorder %v1149_v17, 2  ;;  %vm1990_vm3 = vcmp.lt.s32.totalorder %v1989_v8, 2  ;;  %vm1148_vm8 = vweird.f32 %v2350_v60  ;;  %v2022_v60 = vld [vmem:[%s3552_s3 + $0x78] sm:$0xff] }
 0x139   :  { %v326_v10 = vsel %vm324_vm9, %v325_v18, %v323_v34 }
 0x13e   :  { %v2256_v19 = vpop.eup %2255 }
 0x13f   :  { %v2258_v41 = vpop.eup %2257  ;;  %v1155_v12 = vxor.u32 2147483648, %v2256_v19 }
 0x140   :  { %v1152_v43 = vxor.u32 2147483648, %v2258_v41 }
 0x141   :  { %v1156_v6 = vsel %vm1154_vm12, %v1155_v12, %v2258_v41  ;;  %v1996_v45 = vsel %vm1994_vm5, %v1155_v12, %v2258_v41 }
 0x142   :  { %v1153_v33 = vsel %vm1151_vm6, %v2256_v19, %v1152_v43  ;;  %v1993_v44 = vsel %vm1991_vm13, %v2256_v19, %v1152_v43 }
 0x143   :  { %v1157_v21 = vsel %vm1150_vm11, %v1153_v33, %v1156_v6  ;;  %v1997_v40 = vsel %vm1990_vm3, %v1993_v44, %v1996_v45 }
 0x144   :  { %v1158_v0 = vsel %vm1148_vm8, nan, %v1157_v21  ;;  %v1998_v32 = vsel %vm1148_vm8, nan, %v1997_v40 }
 0x145   :  { %v1166_v51 = vmul.f32 %v1158_v0, %v326_v10  ;;  %v2006_v50 = vmul.f32 %v1998_v32, %v326_v10 }
 0x147   :  { %v2031_v57 = vmul.f32 %v3374_v30, %v1166_v51  ;;  %v2064_v25 = vmul.f32 %v3374_v30, %v2006_v50 }
 0x149   :  { %v2040_v35 = vadd.f32 %v3379_v22, %v2031_v57  ;;  %v2072_v5 = vadd.f32 %v2064_v25, %v3379_v22 }
 0x14b   :  { %v2048_v28 = vadd.f32 %v2040_v35, %v2014_v47  ;;  %v2080_v53 = vadd.f32 %v2072_v5, %v2022_v60 }
 0x14d   :  { %2056 = vst [vmem:[%s3553_s4 + $0x38] sm:$0xff] %v2048_v28  ;;  %2088 = vst [vmem:[%s3553_s4 + $0x78] sm:$0xff] %v2080_v53 }

</bundles_post_ra>
